<compile_context>
chip_gen: v7x
topology: tpu7x:2x2x1
jax: 0.10.0
libtpu: 0.0.40
codegen_flags: <defaults>
</compile_context>

<pallas_src>
import numpy as np
import jax
import jax.numpy as jnp
from jax import lax
from jax.experimental import pallas as pl
from jax.experimental.pallas import tpu as pltpu

N_K = 5          # Kannala-Brandt distortion coeffs
N_KPOLY = 14     # polynomial correction coeffs
N_RAW_PARAMS = 4 + 2 + 1 + N_K + N_KPOLY + 1 + 1   # = 28 (module layout)
N_EFF_PARAMS = 4 + 2 + N_K + 7 + 7                 # = 25 (folded layout)

LANES = 128
ROW_TILE_CAP = 2048    # rows per grid block: (2048,128) f32 = 1 MiB / input buffer
ROW_CHUNK = 256        # rows per in-kernel strip (bounds live vregs / scratch)

# --- sincos constants (single-precision, cephes/fdlibm style) ---
_TWO_OVER_PI = 0.6366197723675814
_PIO2_HI = 1.57079637050628662109375     # float32(pi/2)
_PIO2_LO = -4.371139000186243e-08        # pi/2 - float32(pi/2)
_SIN_C1 = -1.6666654611e-01
_SIN_C2 = 8.3321608736e-03
_SIN_C3 = -1.9515295891e-04
_COS_C1 = 4.166664568298827e-02
_COS_C2 = -1.388731625493765e-03
_COS_C3 = 2.443315711809948e-05


def _round_up(x, m):
    return -(-x // m) * m


def _cdiv(a, b):
    return -(-a // b)


def _perm_matrices():
    """Constant 0/1 matrices scattering x[j]->lane 2j and y[j]->lane 2j+1."""
    px = np.zeros((LANES, 2 * LANES), np.float32)
    py = np.zeros((LANES, 2 * LANES), np.float32)
    j = np.arange(LANES)
    px[j, 2 * j] = 1.0
    py[j, 2 * j + 1] = 1.0
    return jnp.asarray(px), jnp.asarray(py)


_PX, _PY = _perm_matrices()


def _sincos(theta):
    """sin/cos via one shared range reduction + short minimax polynomials."""
    nf = jnp.floor(theta * _TWO_OVER_PI + 0.5)
    r = theta - nf * _PIO2_HI
    r = r - nf * _PIO2_LO
    q = nf.astype(jnp.int32)
    r2 = r * r
    s = ((_SIN_C3 * r2 + _SIN_C2) * r2 + _SIN_C1) * r2 * r + r
    c = ((_COS_C3 * r2 + _COS_C2) * r2 + _COS_C1) * (r2 * r2) - 0.5 * r2 + 1.0
    swap = (q & 1) != 0
    sin_b = jnp.where(swap, c, s)
    cos_b = jnp.where(swap, s, c)
    sin_t = jnp.where((q & 2) != 0, -sin_b, sin_b)
    cos_t = jnp.where(((q + 1) & 2) != 0, -cos_b, cos_b)
    return sin_t, cos_t


def _altaz_kernel(p_ref, px_ref, py_ref, alt_ref, az_ref, out_ref):
    """p_ref: (25,) f32 SMEM; px/py: (128,256) f32; alt/az: (T,128); out: (T,256)."""
    # --- unpack folded scalar parameters from SMEM (once per grid step) ---
    r00, r01, r10, r11 = p_ref[0], p_ref[1], p_ref[2], p_ref[3]
    t0, t1 = p_ref[4], p_ref[5]
    # scale already folded into k0..k4
    k0, k1, k2, k3, k4 = p_ref[6], p_ref[7], p_ref[8], p_ref[9], p_ref[10]
    a0, a1, a2, a3, a4, a5 = (p_ref[11], p_ref[12], p_ref[13],
                              p_ref[14], p_ref[15], p_ref[16])
    cx = p_ref[17]                      # kp[6] + x0
    b0, b1, b2, b3, b4, b5 = (p_ref[18], p_ref[19], p_ref[20],
                              p_ref[21], p_ref[22], p_ref[23])
    cy = p_ref[24]                      # kp[13] + y0

    # Interleave matrices stay VMEM-resident; hoist the loads out of the loop.
    px = px_ref[...]
    py = py_ref[...]

    # static strip-mining over the (large) BlockSpec tile
    block_rows = alt_ref.shape[0]
    if block_rows % ROW_CHUNK == 0:
        chunk = ROW_CHUNK
    elif block_rows % 128 == 0:
        chunk = 128
    elif block_rows % 64 == 0:
        chunk = 64
    else:
        chunk = block_rows
    nchunks = block_rows // chunk

    def process(r0):
        rs = pl.ds(r0, chunk)
        alt = alt_ref[rs, :]
        az = az_ref[rs, :]

        # rho/theta from the 2x2 "rotation" + translation (pure VPU; too
        # narrow for the MXU on purpose).
        rho = alt * r00 + az * r01 + t0
        theta = alt * r10 + az * r11 + t1

        # Kannala-Brandt projection, Horner in rho^2 (scale folded into k_i).
        rho2 = rho * rho
        proj = ((((k4 * rho2 + k3) * rho2 + k2) * rho2 + k1) * rho2 + k0) * rho

        sin_t, cos_t = _sincos(theta)
        x = proj * cos_t
        y = proj * sin_t

        # polynomial correction (Horner-grouped); x0/y0 folded into cx/cy
        xy = x * y
        rx = x * (a0 + x * (a1 + x * a2)) + y * (a3 + y * a4) + a5 * xy + cx
        ry = x * (b0 + x * (b1 + x * b2)) + y * (b3 + y * b4) + b5 * xy + cy

        # Lane interleave x0,y0,x1,y1,... via 0/1 permutation matmuls on the
        # otherwise-idle MXU.  HIGHEST precision => exact f32 routing, so the
        # (rows, 256) output reshapes to (N, 2) as a pure bitcast.
        inter = (jnp.dot(rx, px, precision=lax.Precision.HIGHEST,
                         preferred_element_type=jnp.float32)
                 + jnp.dot(ry, py, precision=lax.Precision.HIGHEST,
                           preferred_element_type=jnp.float32))
        out_ref[rs, :] = inter

    if nchunks == 1:
        process(0)
    else:
        def body(ci, carry):
            process(pl.multiple_of(ci * chunk, chunk))
            return carry
        lax.fori_loop(0, nchunks, body, 0)


def _fold_params(params):
    """Raw 28-element module params -> 25-element folded params (scalar math)."""
    params = params.astype(jnp.float32)
    r = params[0:4]
    t = params[4:6]
    scale = params[6]
    k_eff = params[7:7 + N_K] * scale
    kp = params[7 + N_K:7 + N_K + N_KPOLY]
    x0 = params[26]
    y0 = params[27]
    return jnp.concatenate([
        r, t, k_eff,
        kp[0:6], jnp.reshape(kp[6] + x0, (1,)),
        kp[7:13], jnp.reshape(kp[13] + y0, (1,)),
    ])


@jax.jit
def altaz_to_photo(alt, az, params):
    """alt, az: (N,) float32; params: (28,) float32 (module layout) -> (N, 2)."""
    n = alt.shape[0]
    eff = _fold_params(params)

    rows = _cdiv(n, LANES)
    n_pad = rows * LANES
    if n_pad != n:
        # TODO(synk): extra input pass only for N % 128 != 0; could be folded
        # into the kernel (masked tail) or allow_input_fusion.
        alt = jnp.pad(alt, (0, n_pad - n))
        az = jnp.pad(az, (0, n_pad - n))

    alt2 = alt.reshape(rows, LANES)   # bitcast view
    az2 = az.reshape(rows, LANES)

    # Tiling: >= 2 grid steps whenever there is enough work (v7x two-core
    # sharding), tiles capped at ROW_TILE_CAP rows, ragged last block (no
    # array-level tile padding -> no extra HBM traffic).
    if rows < 16:
        row_tile = rows                       # single full-extent block
    else:
        steps = max(2, _cdiv(rows, ROW_TILE_CAP))
        gran = 256 if rows >= 512 else (64 if rows >= 128 else 8)
        row_tile = _round_up(_cdiv(rows, steps), gran)
    grid = (_cdiv(rows, row_tile),)

    in_vspec = pl.BlockSpec((row_tile, LANES), lambda i: (i, 0))
    perm_spec = pl.BlockSpec((LANES, 2 * LANES), lambda i: (0, 0))
    out_vspec = pl.BlockSpec((row_tile, 2 * LANES), lambda i: (i, 0))

    cost = pl.CostEstimate(
        flops=int(n_pad) * 1114,                     # ~90 VPU + 1024 MXU flops/pt
        transcendentals=0,                           # sincos is hand-rolled
        bytes_accessed=16 * int(n_pad) + 2 * LANES * 2 * LANES * 4
        + 4 * N_EFF_PARAMS)

    o2d = pl.pallas_call(
        _altaz_kernel,
        out_shape=jax.ShapeDtypeStruct((rows, 2 * LANES), jnp.float32),
        grid_spec=pltpu.PrefetchScalarGridSpec(
            num_scalar_prefetch=0,
            grid=grid,
            in_specs=[
                pl.BlockSpec(memory_space=pltpu.MemorySpace.SMEM),  # folded params
                perm_spec,                                          # Px
                perm_spec,                                          # Py
                in_vspec,                                           # alt
                in_vspec,                                           # az
            ],
            out_specs=out_vspec,
        ),
        compiler_params=pltpu.CompilerParams(
            dimension_semantics=("parallel",)),
        cost_estimate=cost,
    )(eff, _PX, _PY, alt2, az2)

    # Each 256-wide row is already x0,y0,x1,y1,... -> reshape is a bitcast.
    out = o2d.reshape(n_pad, 2)
    if n_pad != n:
        out = out[:n]
    return out


def _ref_forward(alt, az, params):
    """Pure-JAX reference mirroring the PyTorch module exactly."""
    r00, r01, r10, r11 = params[0], params[1], params[2], params[3]
    t0, t1, scale = params[4], params[5], params[6]
    k = params[7:7 + N_K]
    kp = params[7 + N_K:7 + N_K + N_KPOLY]
    x0 = params[26]
    y0 = params[27]
    rho = alt * r00 + az * r01 + t0
    theta = alt * r10 + az * r11 + t1
    proj = 0.0
    for ik in range(N_K):
        proj = proj + k[ik] * rho ** (2 * ik + 1)
    rho = scale * proj
    x = rho * jnp.cos(theta)
    y = rho * jnp.sin(theta)
    rx = (kp[0] * x + kp[1] * x**2 + kp[2] * x**3 + kp[3] * y + kp[4] * y**2
          + kp[5] * y * x + kp[6])
    ry = (kp[7] * x + kp[8] * x**2 + kp[9] * x**3 + kp[10] * y + kp[11] * y**2
          + kp[12] * y * x + kp[13])
    return jnp.stack([rx + x0, ry + y0], axis=1)


if __name__ == "__main__":
    key = jax.random.PRNGKey(0)

    # Deterministic, physically plausible camera parameters (module layout).
    R = jnp.array([[1.0, 0.0], [0.0, 1.0]], dtype=jnp.float32)
    t = jnp.array([0.05, -0.35], dtype=jnp.float32)
    scale = jnp.array([0.5], dtype=jnp.float32)
    k_dist = jnp.array([0.95, -0.12, 0.031, -0.0045, 0.00067], dtype=jnp.float32)
    k_poly = jnp.array(
        [0.144052, -0.000103, -0.000423, -0.241509, -0.000279, 1.4e-05,
         0.010287, 0.24153, 4.7e-05, -3.2e-05, 0.143713, -0.000366,
         -5.8e-05, 0.007811], dtype=jnp.float32)
    x0 = jnp.array([0.5], dtype=jnp.float32)
    y0 = jnp.array([0.5], dtype=jnp.float32)

    params = jnp.concatenate(
        [R.reshape(-1), t, scale, k_dist, k_poly, x0, y0]).astype(jnp.float32)
    assert params.shape == (N_RAW_PARAMS,)

    # Sizes chosen to exercise: multi-step grid (2048), ragged-N pad path
    # (1000), and ragged last block + in-kernel strip-mine loop (38405).
    for n in (2048, 1000, 38405):
        k_alt, k_az = jax.random.split(jax.random.fold_in(key, n), 2)
        alt = jax.random.uniform(k_alt, (n,), dtype=jnp.float32) * (jnp.pi / 2)
        az = jax.random.uniform(k_az, (n,), dtype=jnp.float32) * (2 * jnp.pi)

        out = jax.block_until_ready(altaz_to_photo(alt, az, params))
        ref = _ref_forward(alt, az, params)
        np.testing.assert_allclose(np.asarray(out), np.asarray(ref),
                                   rtol=1e-5, atol=2e-5)
        assert out.shape == (n, 2)

    print("KERNEL_OK")
</pallas_src>

<mosaic_0001>
module attributes {stable_mosaic.version = 11 : i64} {
  func.func @_altaz_kernel(%arg0: i32, %arg1: memref<25xf32, #tpu.memory_space<smem>>, %arg2: memref<128x256xf32, #tpu.memory_space<vmem>>, %arg3: memref<128x256xf32, #tpu.memory_space<vmem>>, %arg4: memref<8x128xf32, #tpu.memory_space<vmem>>, %arg5: memref<8x128xf32, #tpu.memory_space<vmem>>, %arg6: memref<8x256xf32, #tpu.memory_space<vmem>>) attributes {dimension_semantics = [#tpu.dimension_semantics<parallel>], iteration_bounds = array<i64: 2>, scalar_prefetch = 0 : i64, scratch_operands = 0 : i64, tpu.core_type = #tpu.core_type<tc>, window_params = [{transform_indices = @transform_0, window_bounds = array<i64: 25>}, {pipeline_mode = #tpu.pipeline_mode<synchronous>, transform_indices = @transform_1, window_bounds = array<i64: 128, 256>}, {pipeline_mode = #tpu.pipeline_mode<synchronous>, transform_indices = @transform_2, window_bounds = array<i64: 128, 256>}, {transform_indices = @transform_3, window_bounds = array<i64: 8, 128>}, {transform_indices = @transform_4, window_bounds = array<i64: 8, 128>}, {transform_indices = @transform_5, window_bounds = array<i64: 8, 256>}]} {
    %c0 = arith.constant 0 : index
    %0 = memref.load %arg1[%c0] : memref<25xf32, #tpu.memory_space<smem>>
    %c1 = arith.constant 1 : index
    %1 = memref.load %arg1[%c1] : memref<25xf32, #tpu.memory_space<smem>>
    %c2 = arith.constant 2 : index
    %2 = memref.load %arg1[%c2] : memref<25xf32, #tpu.memory_space<smem>>
    %c3 = arith.constant 3 : index
    %3 = memref.load %arg1[%c3] : memref<25xf32, #tpu.memory_space<smem>>
    %c4 = arith.constant 4 : index
    %4 = memref.load %arg1[%c4] : memref<25xf32, #tpu.memory_space<smem>>
    %c5 = arith.constant 5 : index
    %5 = memref.load %arg1[%c5] : memref<25xf32, #tpu.memory_space<smem>>
    %c6 = arith.constant 6 : index
    %6 = memref.load %arg1[%c6] : memref<25xf32, #tpu.memory_space<smem>>
    %c7 = arith.constant 7 : index
    %7 = memref.load %arg1[%c7] : memref<25xf32, #tpu.memory_space<smem>>
    %c8 = arith.constant 8 : index
    %8 = memref.load %arg1[%c8] : memref<25xf32, #tpu.memory_space<smem>>
    %c9 = arith.constant 9 : index
    %9 = memref.load %arg1[%c9] : memref<25xf32, #tpu.memory_space<smem>>
    %c10 = arith.constant 10 : index
    %10 = memref.load %arg1[%c10] : memref<25xf32, #tpu.memory_space<smem>>
    %c11 = arith.constant 11 : index
    %11 = memref.load %arg1[%c11] : memref<25xf32, #tpu.memory_space<smem>>
    %c12 = arith.constant 12 : index
    %12 = memref.load %arg1[%c12] : memref<25xf32, #tpu.memory_space<smem>>
    %c13 = arith.constant 13 : index
    %13 = memref.load %arg1[%c13] : memref<25xf32, #tpu.memory_space<smem>>
    %c14 = arith.constant 14 : index
    %14 = memref.load %arg1[%c14] : memref<25xf32, #tpu.memory_space<smem>>
    %c15 = arith.constant 15 : index
    %15 = memref.load %arg1[%c15] : memref<25xf32, #tpu.memory_space<smem>>
    %c16 = arith.constant 16 : index
    %16 = memref.load %arg1[%c16] : memref<25xf32, #tpu.memory_space<smem>>
    %c17 = arith.constant 17 : index
    %17 = memref.load %arg1[%c17] : memref<25xf32, #tpu.memory_space<smem>>
    %c18 = arith.constant 18 : index
    %18 = memref.load %arg1[%c18] : memref<25xf32, #tpu.memory_space<smem>>
    %c19 = arith.constant 19 : index
    %19 = memref.load %arg1[%c19] : memref<25xf32, #tpu.memory_space<smem>>
    %c20 = arith.constant 20 : index
    %20 = memref.load %arg1[%c20] : memref<25xf32, #tpu.memory_space<smem>>
    %c21 = arith.constant 21 : index
    %21 = memref.load %arg1[%c21] : memref<25xf32, #tpu.memory_space<smem>>
    %c22 = arith.constant 22 : index
    %22 = memref.load %arg1[%c22] : memref<25xf32, #tpu.memory_space<smem>>
    %c23 = arith.constant 23 : index
    %23 = memref.load %arg1[%c23] : memref<25xf32, #tpu.memory_space<smem>>
    %c24 = arith.constant 24 : index
    %24 = memref.load %arg1[%c24] : memref<25xf32, #tpu.memory_space<smem>>
    %c0_0 = arith.constant 0 : index
    %c0_1 = arith.constant 0 : index
    %25 = vector.load %arg2[%c0_0, %c0_1] : memref<128x256xf32, #tpu.memory_space<vmem>>, vector<128x256xf32>
    %c0_2 = arith.constant 0 : index
    %c0_3 = arith.constant 0 : index
    %26 = vector.load %arg3[%c0_2, %c0_3] : memref<128x256xf32, #tpu.memory_space<vmem>>, vector<128x256xf32>
    %c0_4 = arith.constant 0 : index
    %c0_5 = arith.constant 0 : index
    %27 = vector.load %arg4[%c0_4, %c0_5] : memref<8x128xf32, #tpu.memory_space<vmem>>, vector<8x128xf32>
    %c0_6 = arith.constant 0 : index
    %c0_7 = arith.constant 0 : index
    %28 = vector.load %arg5[%c0_6, %c0_7] : memref<8x128xf32, #tpu.memory_space<vmem>>, vector<8x128xf32>
    %29 = vector.broadcast %0 : f32 to vector<8x128xf32>
    %30 = arith.mulf %27, %29 : vector<8x128xf32>
    %31 = vector.broadcast %1 : f32 to vector<8x128xf32>
    %32 = arith.mulf %28, %31 : vector<8x128xf32>
    %33 = arith.addf %30, %32 : vector<8x128xf32>
    %34 = vector.broadcast %4 : f32 to vector<8x128xf32>
    %35 = arith.addf %33, %34 : vector<8x128xf32>
    %36 = vector.broadcast %2 : f32 to vector<8x128xf32>
    %37 = arith.mulf %27, %36 : vector<8x128xf32>
    %38 = vector.broadcast %3 : f32 to vector<8x128xf32>
    %39 = arith.mulf %28, %38 : vector<8x128xf32>
    %40 = arith.addf %37, %39 : vector<8x128xf32>
    %41 = vector.broadcast %5 : f32 to vector<8x128xf32>
    %42 = arith.addf %40, %41 : vector<8x128xf32>
    %43 = arith.mulf %35, %35 : vector<8x128xf32>
    %44 = vector.broadcast %10 : f32 to vector<8x128xf32>
    %45 = arith.mulf %44, %43 : vector<8x128xf32>
    %46 = vector.broadcast %9 : f32 to vector<8x128xf32>
    %47 = arith.addf %45, %46 : vector<8x128xf32>
    %48 = arith.mulf %47, %43 : vector<8x128xf32>
    %49 = vector.broadcast %8 : f32 to vector<8x128xf32>
    %50 = arith.addf %48, %49 : vector<8x128xf32>
    %51 = arith.mulf %50, %43 : vector<8x128xf32>
    %52 = vector.broadcast %7 : f32 to vector<8x128xf32>
    %53 = arith.addf %51, %52 : vector<8x128xf32>
    %54 = arith.mulf %53, %43 : vector<8x128xf32>
    %55 = vector.broadcast %6 : f32 to vector<8x128xf32>
    %56 = arith.addf %54, %55 : vector<8x128xf32>
    %57 = arith.mulf %56, %35 : vector<8x128xf32>
    %cst = arith.constant 0.636619746 : f32
    %58 = vector.broadcast %cst : f32 to vector<8x128xf32>
    %59 = arith.mulf %42, %58 : vector<8x128xf32>
    %cst_8 = arith.constant 5.000000e-01 : f32
    %60 = vector.broadcast %cst_8 : f32 to vector<8x128xf32>
    %61 = arith.addf %59, %60 : vector<8x128xf32>
    %62 = math.floor %61 : vector<8x128xf32>
    %cst_9 = arith.constant 1.57079637 : f32
    %63 = vector.broadcast %cst_9 : f32 to vector<8x128xf32>
    %64 = arith.mulf %62, %63 : vector<8x128xf32>
    %65 = arith.subf %42, %64 : vector<8x128xf32>
    %cst_10 = arith.constant -4.37113883E-8 : f32
    %66 = vector.broadcast %cst_10 : f32 to vector<8x128xf32>
    %67 = arith.mulf %62, %66 : vector<8x128xf32>
    %68 = arith.subf %65, %67 : vector<8x128xf32>
    %69 = arith.fptosi %62 : vector<8x128xf32> to vector<8x128xi32>
    %70 = arith.mulf %68, %68 : vector<8x128xf32>
    %cst_11 = arith.constant -1.95152956E-4 : f32
    %71 = vector.broadcast %cst_11 : f32 to vector<8x128xf32>
    %72 = arith.mulf %71, %70 : vector<8x128xf32>
    %cst_12 = arith.constant 0.00833216123 : f32
    %73 = vector.broadcast %cst_12 : f32 to vector<8x128xf32>
    %74 = arith.addf %72, %73 : vector<8x128xf32>
    %75 = arith.mulf %74, %70 : vector<8x128xf32>
    %cst_13 = arith.constant -0.166666552 : f32
    %76 = vector.broadcast %cst_13 : f32 to vector<8x128xf32>
    %77 = arith.addf %75, %76 : vector<8x128xf32>
    %78 = arith.mulf %77, %70 : vector<8x128xf32>
    %79 = arith.mulf %78, %68 : vector<8x128xf32>
    %80 = arith.addf %79, %68 : vector<8x128xf32>
    %cst_14 = arith.constant 2.44331568E-5 : f32
    %81 = vector.broadcast %cst_14 : f32 to vector<8x128xf32>
    %82 = arith.mulf %81, %70 : vector<8x128xf32>
    %cst_15 = arith.constant -0.00138873165 : f32
    %83 = vector.broadcast %cst_15 : f32 to vector<8x128xf32>
    %84 = arith.addf %82, %83 : vector<8x128xf32>
    %85 = arith.mulf %84, %70 : vector<8x128xf32>
    %cst_16 = arith.constant 0.0416666456 : f32
    %86 = vector.broadcast %cst_16 : f32 to vector<8x128xf32>
    %87 = arith.addf %85, %86 : vector<8x128xf32>
    %88 = arith.mulf %70, %70 : vector<8x128xf32>
    %89 = arith.mulf %87, %88 : vector<8x128xf32>
    %cst_17 = arith.constant 5.000000e-01 : f32
    %90 = vector.broadcast %cst_17 : f32 to vector<8x128xf32>
    %91 = arith.mulf %90, %70 : vector<8x128xf32>
    %92 = arith.subf %89, %91 : vector<8x128xf32>
    %cst_18 = arith.constant 1.000000e+00 : f32
    %93 = vector.broadcast %cst_18 : f32 to vector<8x128xf32>
    %94 = arith.addf %92, %93 : vector<8x128xf32>
    %c1_i32 = arith.constant 1 : i32
    %95 = vector.broadcast %c1_i32 : i32 to vector<8x128xi32>
    %96 = arith.andi %69, %95 : vector<8x128xi32>
    %c0_i32 = arith.constant 0 : i32
    %97 = vector.broadcast %c0_i32 : i32 to vector<8x128xi32>
    %98 = arith.cmpi ne, %96, %97 : vector<8x128xi32>
    %99 = arith.select %98, %94, %80 : vector<8x128xi1>, vector<8x128xf32>
    %100 = arith.select %98, %80, %94 : vector<8x128xi1>, vector<8x128xf32>
    %c2_i32 = arith.constant 2 : i32
    %101 = vector.broadcast %c2_i32 : i32 to vector<8x128xi32>
    %102 = arith.andi %69, %101 : vector<8x128xi32>
    %c0_i32_19 = arith.constant 0 : i32
    %103 = vector.broadcast %c0_i32_19 : i32 to vector<8x128xi32>
    %104 = arith.cmpi ne, %102, %103 : vector<8x128xi32>
    %cst_20 = arith.constant 0.000000e+00 : f32
    %105 = vector.broadcast %cst_20 : f32 to vector<8x128xf32>
    %106 = arith.subf %105, %99 : vector<8x128xf32>
    %107 = arith.select %104, %106, %99 : vector<8x128xi1>, vector<8x128xf32>
    %c1_i32_21 = arith.constant 1 : i32
    %108 = vector.broadcast %c1_i32_21 : i32 to vector<8x128xi32>
    %109 = arith.addi %69, %108 : vector<8x128xi32>
    %c2_i32_22 = arith.constant 2 : i32
    %110 = vector.broadcast %c2_i32_22 : i32 to vector<8x128xi32>
    %111 = arith.andi %109, %110 : vector<8x128xi32>
    %c0_i32_23 = arith.constant 0 : i32
    %112 = vector.broadcast %c0_i32_23 : i32 to vector<8x128xi32>
    %113 = arith.cmpi ne, %111, %112 : vector<8x128xi32>
    %cst_24 = arith.constant 0.000000e+00 : f32
    %114 = vector.broadcast %cst_24 : f32 to vector<8x128xf32>
    %115 = arith.subf %114, %100 : vector<8x128xf32>
    %116 = arith.select %113, %115, %100 : vector<8x128xi1>, vector<8x128xf32>
    %117 = arith.mulf %57, %116 : vector<8x128xf32>
    %118 = arith.mulf %57, %107 : vector<8x128xf32>
    %119 = arith.mulf %117, %118 : vector<8x128xf32>
    %120 = vector.broadcast %13 : f32 to vector<8x128xf32>
    %121 = arith.mulf %117, %120 : vector<8x128xf32>
    %122 = vector.broadcast %12 : f32 to vector<8x128xf32>
    %123 = arith.addf %122, %121 : vector<8x128xf32>
    %124 = arith.mulf %117, %123 : vector<8x128xf32>
    %125 = vector.broadcast %11 : f32 to vector<8x128xf32>
    %126 = arith.addf %125, %124 : vector<8x128xf32>
    %127 = arith.mulf %117, %126 : vector<8x128xf32>
    %128 = vector.broadcast %15 : f32 to vector<8x128xf32>
    %129 = arith.mulf %118, %128 : vector<8x128xf32>
    %130 = vector.broadcast %14 : f32 to vector<8x128xf32>
    %131 = arith.addf %130, %129 : vector<8x128xf32>
    %132 = arith.mulf %118, %131 : vector<8x128xf32>
    %133 = arith.addf %127, %132 : vector<8x128xf32>
    %134 = vector.broadcast %16 : f32 to vector<8x128xf32>
    %135 = arith.mulf %134, %119 : vector<8x128xf32>
    %136 = arith.addf %133, %135 : vector<8x128xf32>
    %137 = vector.broadcast %17 : f32 to vector<8x128xf32>
    %138 = arith.addf %136, %137 : vector<8x128xf32>
    %139 = vector.broadcast %20 : f32 to vector<8x128xf32>
    %140 = arith.mulf %117, %139 : vector<8x128xf32>
    %141 = vector.broadcast %19 : f32 to vector<8x128xf32>
    %142 = arith.addf %141, %140 : vector<8x128xf32>
    %143 = arith.mulf %117, %142 : vector<8x128xf32>
    %144 = vector.broadcast %18 : f32 to vector<8x128xf32>
    %145 = arith.addf %144, %143 : vector<8x128xf32>
    %146 = arith.mulf %117, %145 : vector<8x128xf32>
    %147 = vector.broadcast %22 : f32 to vector<8x128xf32>
    %148 = arith.mulf %118, %147 : vector<8x128xf32>
    %149 = vector.broadcast %21 : f32 to vector<8x128xf32>
    %150 = arith.addf %149, %148 : vector<8x128xf32>
    %151 = arith.mulf %118, %150 : vector<8x128xf32>
    %152 = arith.addf %146, %151 : vector<8x128xf32>
    %153 = vector.broadcast %23 : f32 to vector<8x128xf32>
    %154 = arith.mulf %153, %119 : vector<8x128xf32>
    %155 = arith.addf %152, %154 : vector<8x128xf32>
    %156 = vector.broadcast %24 : f32 to vector<8x128xf32>
    %157 = arith.addf %155, %156 : vector<8x128xf32>
    %cst_25 = arith.constant dense<0.000000e+00> : vector<8x256xf32>
    %158 = tpu.matmul %138, %25, %cst_25 {dimension_numbers = #tpu.dot_dimension_numbers<[1], [0], [0], [1], [0, 0, 1, 1], [], []>, precision = #tpu.contract_precision<fp32>} : vector<8x128xf32>, vector<128x256xf32>, vector<8x256xf32> -> vector<8x256xf32>
    %cst_26 = arith.constant dense<0.000000e+00> : vector<8x256xf32>
    %159 = tpu.matmul %157, %26, %cst_26 {dimension_numbers = #tpu.dot_dimension_numbers<[1], [0], [0], [1], [0, 0, 1, 1], [], []>, precision = #tpu.contract_precision<fp32>} : vector<8x128xf32>, vector<128x256xf32>, vector<8x256xf32> -> vector<8x256xf32>
    %160 = arith.addf %158, %159 : vector<8x256xf32>
    %c0_27 = arith.constant 0 : index
    %c0_28 = arith.constant 0 : index
    %161 = vector.load %arg6[%c0_27, %c0_28] : memref<8x256xf32, #tpu.memory_space<vmem>>, vector<8x256xf32>
    tpu.vector_store %arg6[%c0_27, %c0_28], %160 {strides = array<i32>} : memref<8x256xf32, #tpu.memory_space<vmem>>, vector<8x256xf32>,
    return
  }
  func.func @transform_0(%arg0: i32) -> i32 {
    %c0_i32 = arith.constant 0 : i32
    %c0_i32_0 = arith.constant 0 : i32
    return %c0_i32 : i32
  }
  func.func @transform_1(%arg0: i32) -> (i32, i32) {
    %c0_i32 = arith.constant 0 : i32
    %c0_i32_0 = arith.constant 0 : i32
    %c0_i32_1 = arith.constant 0 : i32
    return %c0_i32, %c0_i32_0 : i32, i32
  }
  func.func @transform_2(%arg0: i32) -> (i32, i32) {
    %c0_i32 = arith.constant 0 : i32
    %c0_i32_0 = arith.constant 0 : i32
    %c0_i32_1 = arith.constant 0 : i32
    return %c0_i32, %c0_i32_0 : i32, i32
  }
  func.func @transform_3(%arg0: i32) -> (i32, i32) {
    %c0_i32 = arith.constant 0 : i32
    %c0_i32_0 = arith.constant 0 : i32
    return %arg0, %c0_i32 : i32, i32
  }
  func.func @transform_4(%arg0: i32) -> (i32, i32) {
    %c0_i32 = arith.constant 0 : i32
    %c0_i32_0 = arith.constant 0 : i32
    return %arg0, %c0_i32 : i32, i32
  }
  func.func @transform_5(%arg0: i32) -> (i32, i32) {
    %c0_i32 = arith.constant 0 : i32
    %c0_i32_0 = arith.constant 0 : i32
    return %arg0, %c0_i32 : i32, i32
  }
}

</mosaic_0001>

<bundles_post_ra>
// kernel: altaz_to_photo.1
= control target key start
LH: loop header
LB: loop body
LE: loop exit
PB: predicated region body
PF: predicated region fallthrough
CT: control target
= control target key end

     0   :  { %10 = vsyncpa [#allocation4], 0  ;;  %s4183_s0 = inlined_call_operand.vmem [shape: f32[25], index: 0, kind: input, shape index: {}]   ;;  %s4184_s1 = inlined_call_operand.hbm [shape: f32[128,256], index: 1, kind: input, shape index: {}]   ;;  %s4185_s2 = inlined_call_operand.hbm [shape: f32[128,256], index: 2, kind: input, shape index: {}]   ;;  %s4186_s3 = inlined_call_operand.vmem [shape: f32[16,128], index: 3, kind: input, shape index: {}]   ;;  %s4187_s4 = inlined_call_operand.vmem [shape: f32[16,128], index: 4, kind: input, shape index: {}]   ;;  %s4188_s5 = inlined_call_operand.vmem [shape: f32[16,256], index: 5, kind: output, shape index: {}]  }
   0x1   :  { %11 = vsyncpa [#allocation3], 0 }
   0x2   :  { %12 = vsyncpa [#allocation7], 0  ;;  %s2914_s18 = smov 0  }
   0x3 LB: > { %s177_s21 = sshll.u32 %s4183_s0, 4  ;;  %s2923_s22 = sadd.s32 4294967295, %s2876_s18   ;;  %s2876_s18 = sphi %s2914_s18, %s18_s18   ;;  %s178_s21 = int_to_ptr.vmem [resolvable:$true] %s177_s21 }
   0x4   : > { %p2297_p0 = scmp.ge.s32.totalorder %s2876_s18, 1  ;;  %p164_p1 = scmp.lt.s32.totalorder %s2876_s18, 3 }
   0x5   : > { %p2767_p2 = scmp.eq.s32.totalorder %s2923_s22, 0  ;;  %s2878_s24 = smov [#allocation5]  }
   0x6   : > { %p2928_p3 = pnand %p2297_p0, %p164_p1  ;;  %s187_s25 = sshll.u32 %s2878_s24, 4  ;;  %s2940_s25 = int_to_ptr.vmem [resolvable:$true] %s187_s25 }
   0x7   : > { %s2879_s27 = smov [#allocation6]   ;;  %s2787_s29 = scalar_lea.vmem %s178_s21, 16 }
   0x8   : > { %p2757_p4 = pneg %p2928_p3  ;;  %s200_s28 = sshll.u32 %s2879_s27, 4  ;;  %s2942_s28 = int_to_ptr.vmem [resolvable:$true] %s200_s28 }
   0x9   : > { %p2788_p6 = scmp.ne.s32.totalorder %s178_s21, %s2787_s29  ;;  %p2795_p10 = scmp.lt.s32.totalorder %s178_s21, %s178_s21 }
   0xa   : > { %p2936_p5 = pnand %p2767_p2, %p2757_p4  ;;  %p2796_p11 = scmp.lt.s32.totalorder %s2787_s29, %s2787_s29 }
   0xc   : > { %p2946_p7 = pneg %p2936_p5  ;;  %p2797_p12 = por %p2796_p11, %p2795_p10 }
   0xe   : > { %p2790_p8 = pnand %p2946_p7, %p2788_p6 }
  0x10   : > { %p2791_p9 = pneg %p2790_p8 }
  0x12   : > { %p2798_p13 = pnand %p2797_p12, %p2791_p9 }
  0x14   : > { %2801 = shalt.err (!%p2798_p13)
}
  0x15   : > { %s2880_s6 = smov [#allocation2]   ;;  %s2802_s9 = scalar_lea.hbm %s4184_s1, 4096 }
  0x16   : > { %2760 = dma.vmem_to_smem (!%p2936_p5), %s178_s21, 16, %s2880_s6, [#allocation4]  }
  0x17   : > { %p2803_p0 = scmp.ne.s32.totalorder %s4184_s1, %s2802_s9  ;;  %p2809_p6 = scmp.lt.u32.totalorder %s2802_s9, %s4184_s1 }
  0x19   : > { %p2805_p1 = pnand %p2803_p0, %p2946_p7 }
  0x1b   : > { %p2806_p4 = pneg %p2805_p1 }
  0x1d   : > { %p2811_p8 = pnand %p2809_p6, %p2806_p4 }
  0x1f   : > { %2814 = shalt.err (!%p2811_p8)
}
  0x20   : > { %s2815_s14 = scalar_lea.vmem %s2940_s25, 4096  ;;  %p2823_p12 = scmp.lt.s32.totalorder %s2940_s25, %s2940_s25 }
  0x21   : > { %p2816_p9 = scmp.ne.s32.totalorder %s2940_s25, %s2815_s14  ;;  %p2824_p13 = scmp.lt.s32.totalorder %s2815_s14, %s2815_s14 }
  0x23   : > { %p2818_p10 = pnand %p2816_p9, %p2946_p7  ;;  %p2825_p0 = por %p2824_p13, %p2823_p12 }
  0x25   : > { %p2819_p11 = pneg %p2818_p10 }
  0x27   : > { %p2826_p1 = pnand %p2825_p0, %p2819_p11 }
  0x29   : > { %2829 = shalt.err (!%p2826_p1)
}
  0x2a   : > { %s2881_s15 = smov 256   ;;  %s2882_s16 = smov 16  }
  0x2b   : > { %2763 = dma.hbm_to_vmem [thread:$0]  (!%p2936_p5), %s4184_s1, 4096, %s2940_s25, [#allocation3], %s2881_s15, %s2881_s15, %s2882_s16  }
  0x2c   : > { %s2830_s24 = scalar_lea.hbm %s4185_s2, 4096 }
  0x2d   : > { %p2831_p4 = scmp.ne.s32.totalorder %s4185_s2, %s2830_s24  ;;  %p2837_p9 = scmp.lt.u32.totalorder %s2830_s24, %s4185_s2 }
  0x2f   : > { %p2833_p6 = pnand %p2831_p4, %p2946_p7 }
  0x31   : > { %p2834_p8 = pneg %p2833_p6 }
  0x33   : > { %p2839_p10 = pnand %p2837_p9, %p2834_p8 }
  0x35   : > { %2842 = shalt.err (!%p2839_p10)
}
  0x36   : > { %s2843_s25 = scalar_lea.vmem %s2942_s28, 4096  ;;  %p2851_p0 = scmp.lt.s32.totalorder %s2942_s28, %s2942_s28 }
  0x37   : > { %p2844_p11 = scmp.ne.s32.totalorder %s2942_s28, %s2843_s25  ;;  %p2852_p1 = scmp.lt.s32.totalorder %s2843_s25, %s2843_s25 }
  0x39   : > { %p2846_p12 = pnand %p2844_p11, %p2946_p7  ;;  %p2853_p4 = por %p2852_p1, %p2851_p0 }
  0x3b   : > { %p2847_p13 = pneg %p2846_p12 }
  0x3d   : > { %p2854_p6 = pnand %p2853_p4, %p2847_p13 }
  0x3f   : > { %2857 = shalt.err (!%p2854_p6)
}
  0x40   : > { %2766 = dma.hbm_to_vmem [thread:$0]  (!%p2936_p5), %s4185_s2, 4096, %s2942_s28, [#allocation7], %s2881_s15, %s2881_s15, %s2882_s16  }
  0x41   : > { %230 = sbr.rel (%p2928_p3) target bundleno = 582 (0x246), region = 40 }
  0x48   : > { %2863 = dma.done.wait (%p2767_p2), [#allocation4], 16  }
  0x49   : > { %2865 = vsyncadd (%p2767_p2), [#allocation4], 4294967280 }
  0x4a   : > { %2867 = dma.done.wait (%p2767_p2), [#allocation3], 4096  }
  0x4b   : > { %2869 = vsyncadd (%p2767_p2), [#allocation3], 4294963200 }
  0x4c   : > { %2871 = dma.done.wait (%p2767_p2), [#allocation7], 4096  }
  0x4d   : > { %2873 = vsyncadd (%p2767_p2), [#allocation7], 4294963200 }
  0x4e   : > { %244 = sfence }
  0x4f   : > { %v341_v0 = vld [vmem:[#allocation6 + $0x8] sm:$0xff]  ;;  %v343_v1 = vld [vmem:[#allocation6 + $0x18] sm:$0xff]  ;;  %v340_v7 = vld [vmem:[#allocation6] sm:$0xff]  ;;  %v4189_v9 = vmov 0.0   ;;  %p270_p2 = scmp.lt.s32.totalorder %s2923_s22, 1  ;;  %s3195_s23 = sld [smem:[#allocation2]] }
  0x50   : > { %v309_v2 = vld [vmem:[#allocation5 + $0x8] sm:$0xff]  ;;  %v482_v3 = vand.u32 4294901760, %v341_v0  ;;  %v486_v4 = vand.u32 4294901760, %v343_v1  ;;  %v311_v5 = vld [vmem:[#allocation5 + $0x18] sm:$0xff]  ;;  %v342_v8 = vld [vmem:[#allocation6 + $0x10] sm:$0xff]  ;;  %578 = vmatprep.mubr.f32.mxu1 %v4189_v9  ;;  %1433 = vmatprep.mubr.f32.mxu0 %v4189_v9  ;;  %v484_v11 = vand.u32 4294901760, %v340_v7 }
  0x51   : > { %v1337_v6 = vand.u32 4294901760, %v309_v2  ;;  %v1341_v10 = vand.u32 4294901760, %v311_v5  ;;  %v488_v12 = vand.u32 4294901760, %v342_v8  ;;  %v308_v13 = vld [vmem:[#allocation5] sm:$0xff]  ;;  %v310_v14 = vld [vmem:[#allocation5 + $0x10] sm:$0xff]  ;;  %v345_v15 = vld [vmem:[#allocation6 + $0x28] sm:$0xff] }
  0x52   : > { %v3016_v16 = vpack.c.bf16 %v486_v4, %v482_v3  ;;  %v3018_v17 = vsub.f32 %v341_v0, %v482_v3  ;;  %v3020_v18 = vsub.f32 %v343_v1, %v486_v4  ;;  %v347_v20 = vld [vmem:[#allocation6 + $0x38] sm:$0xff]  ;;  %v313_v21 = vld [vmem:[#allocation5 + $0x28] sm:$0xff]  ;;  %v3030_v26 = vsub.f32 %v340_v7, %v484_v11  ;;  %v344_v27 = vld [vmem:[#allocation6 + $0x20] sm:$0xff]  ;;  %s4774_s22 = smov (!%p270_p2, %s2923_s22), 1  ;;  %s3197_s26 = sld [smem:[#allocation2 + $0x1]] }
  0x53   : > { %v3022_v19 = vsub.f32 %v309_v2, %v1337_v6  ;;  %v315_v22 = vld [vmem:[#allocation5 + $0x38] sm:$0xff]  ;;  %v3024_v23 = vpack.c.bf16 %v1341_v10, %v1337_v6  ;;  %v3026_v24 = vsub.f32 %v311_v5, %v1341_v10  ;;  %v3028_v25 = vpack.c.bf16 %v488_v12, %v484_v11  ;;  %v346_v32 = vld [vmem:[#allocation6 + $0x30] sm:$0xff]  ;;  %v312_v37 = vld [vmem:[#allocation5 + $0x20] sm:$0xff]  ;;  %s3200_s28 = sld [smem:[#allocation2 + $0x2]]  ;;  %s2306_s30 = sshll.u32 %s4774_s22, 3 }
  0x54   : > { %4411 = vst [vmem:[#allocation11_spill] sm:$0xff] %v3016_v16  ;;  %4412 = vst [vmem:[#allocation12_spill] sm:$0xff] %v3018_v17  ;;  %2338 = vmatprep.subr.bf16.mxu1 %v3016_v16  ;;  %v3033_v28 = vsub.f32 %v342_v8, %v488_v12  ;;  %v1339_v29 = vand.u32 4294901760, %v308_v13  ;;  %v1343_v30 = vand.u32 4294901760, %v310_v14  ;;  %v490_v31 = vand.u32 4294901760, %v345_v15  ;;  %v314_v38 = vld [vmem:[#allocation5 + $0x30] sm:$0xff]  ;;  %s273_s15 = scalar_lea.vmem %s4186_s3, %s2306_s30  ;;  %s277_s20 = scalar_lea.vmem %s4187_s4, %s2306_s30 }
  0x55   : > { %4413 = vst [vmem:[#allocation13_spill] sm:$0xff] %v3020_v18  ;;  %4414 = vst [vmem:[#allocation14_spill] sm:$0xff] %v3022_v19  ;;  %2530 = vmatprep.subr.bf16.mxu0 %v3024_v23  ;;  %2340 = vmatpush1.bf16.msra.mxu1 %v3028_v25  ;;  %v494_v33 = vand.u32 4294901760, %v347_v20  ;;  %v1345_v34 = vand.u32 4294901760, %v313_v21  ;;  %v1349_v35 = vand.u32 4294901760, %v315_v22  ;;  %v492_v36 = vand.u32 4294901760, %v344_v27 }
  0x56   : > { %4415 = vst [vmem:[#allocation15_spill] sm:$0xff] %v3024_v23  ;;  %4416 = vst [vmem:[#allocation16_spill] sm:$0xff] %v3026_v24  ;;  %v3037_v39 = vpack.c.bf16 %v1343_v30, %v1339_v29  ;;  %v3039_v40 = vsub.f32 %v308_v13, %v1339_v29  ;;  %v3041_v41 = vsub.f32 %v310_v14, %v1343_v30  ;;  %v349_v43 = vld [vmem:[#allocation6 + $0x48] sm:$0xff]  ;;  %v351_v44 = vld [vmem:[#allocation6 + $0x58] sm:$0xff]  ;;  %v496_v52 = vand.u32 4294901760, %v346_v32  ;;  %s3214_s10 = sld [smem:[#allocation2 + $0x4]] }
  0x57   : > { %4417 = vst [vmem:[#allocation17_spill] sm:$0xff] %v3028_v25  ;;  %4418 = vst [vmem:[#allocation18_spill] sm:$0xff] %v3030_v26  ;;  %v3043_v42 = vsub.f32 %v345_v15, %v490_v31  ;;  %v317_v45 = vld [vmem:[#allocation5 + $0x48] sm:$0xff]  ;;  %v3045_v46 = vpack.c.bf16 %v494_v33, %v490_v31  ;;  %v3047_v47 = vsub.f32 %v347_v20, %v494_v33  ;;  %v319_v50 = vld [vmem:[#allocation5 + $0x58] sm:$0xff]  ;;  %v1347_v54 = vand.u32 4294901760, %v312_v37  ;;  %s3232_s11 = sld [smem:[#allocation2 + $0x3]] }
  0x58   : > { %4419 = vst [vmem:[#allocation19_spill] sm:$0xff] %v3033_v28  ;;  %4420 = vst [vmem:[#allocation20_spill] sm:$0xff] %v3037_v39  ;;  %v3049_v48 = vpack.c.bf16 %v1349_v35, %v1345_v34  ;;  %v3051_v49 = vsub.f32 %v313_v21, %v1345_v34  ;;  %2532 = vmatpush1.bf16.msra.mxu0 %v3037_v39  ;;  %v3054_v51 = vsub.f32 %v315_v22, %v1349_v35  ;;  %v348_v59 = vld [vmem:[#allocation6 + $0x40] sm:$0xff]  ;;  %v350_v60 = vld [vmem:[#allocation6 + $0x50] sm:$0xff]  ;;  %s3234_s12 = sld [smem:[#allocation2 + $0x5]]  ;;  %s3240_s16 = sld [smem:[#allocation2 + $0x6]] }
  0x59   : > { %4421 = vst [vmem:[#allocation21_spill] sm:$0xff] %v3039_v40  ;;  %4422 = vst [vmem:[#allocation22_spill] sm:$0xff] %v3041_v41  ;;  %v3056_v53 = vsub.f32 %v344_v27, %v492_v36  ;;  %2342 = vmatprep.subr.bf16.mxu1 %v3045_v46  ;;  %v1351_v55 = vand.u32 4294901760, %v314_v38  ;;  %v498_v56 = vand.u32 4294901760, %v349_v43  ;;  %v502_v57 = vand.u32 4294901760, %v351_v44  ;;  %v316_v1 = vld [vmem:[#allocation5 + $0x40] sm:$0xff] }
  0x5a   : > { %4423 = vst [vmem:[#allocation23_spill] sm:$0xff] %v3043_v42  ;;  %4424 = vst [vmem:[#allocation24_spill] sm:$0xff] %v3045_v46  ;;  %2534 = vmatprep.subr.bf16.mxu0 %v3049_v48  ;;  %v1353_v58 = vand.u32 4294901760, %v317_v45  ;;  %v3060_v61 = vpack.c.bf16 %v496_v52, %v492_v36  ;;  %v3062_v62 = vsub.f32 %v346_v32, %v496_v52  ;;  %v1357_v0 = vand.u32 4294901760, %v319_v50  ;;  %v318_v2 = vld [vmem:[#allocation5 + $0x50] sm:$0xff]  ;;  %v353_v3 = vld [vmem:[#allocation6 + $0x68] sm:$0xff] }
  0x5b   : > { %4425 = vst [vmem:[#allocation25_spill] sm:$0xff] %v3047_v47  ;;  %4426 = vst [vmem:[#allocation26_spill] sm:$0xff] %v3049_v48  ;;  %v3064_v63 = vsub.f32 %v312_v37, %v1347_v54  ;;  %v3066_v4 = vpack.c.bf16 %v1351_v55, %v1347_v54  ;;  %v3068_v5 = vsub.f32 %v314_v38, %v1351_v55  ;;  %v355_v8 = vld [vmem:[#allocation6 + $0x78] sm:$0xff]  ;;  %v321_v10 = vld [vmem:[#allocation5 + $0x68] sm:$0xff]  ;;  %v500_v20 = vand.u32 4294901760, %v348_v59  ;;  %s3250_s21 = sld [smem:[#allocation2 + $0x7]] }
  0x5c   : > { %4427 = vst [vmem:[#allocation27_spill] sm:$0xff] %v3051_v49  ;;  %4428 = vst [vmem:[#allocation28_spill] sm:$0xff] %v3054_v51  ;;  %v3070_v6 = vpack.c.bf16 %v502_v57, %v498_v56  ;;  %v3072_v7 = vsub.f32 %v349_v43, %v498_v56  ;;  %v323_v11 = vld [vmem:[#allocation5 + $0x78] sm:$0xff]  ;;  %2344 = vmatpush1.bf16.msra.mxu1 %v3060_v61  ;;  %v3075_v12 = vsub.f32 %v351_v44, %v502_v57  ;;  %v352_v33 = vld [vmem:[#allocation6 + $0x60] sm:$0xff]  ;;  %s3260_s24 = sld [smem:[#allocation2 + $0x8]]  ;;  %s3262_s27 = sld [smem:[#allocation2 + $0xa]] }
  0x5d   : > { %4429 = vst [vmem:[#allocation29_spill] sm:$0xff] %v3056_v53  ;;  %4430 = vst [vmem:[#allocation30_spill] sm:$0xff] %v3060_v61  ;;  %v3077_v13 = vpack.c.bf16 %v1357_v0, %v1353_v58  ;;  %v3079_v14 = vsub.f32 %v317_v45, %v1353_v58  ;;  %v3081_v15 = vsub.f32 %v319_v50, %v1357_v0  ;;  %2536 = vmatpush1.bf16.msra.mxu0 %v3066_v4  ;;  %v354_v38 = vld [vmem:[#allocation6 + $0x70] sm:$0xff]  ;;  %v320_v43 = vld [vmem:[#allocation5 + $0x60] sm:$0xff]  ;;  %s3272_s29 = sld [smem:[#allocation2 + $0x9]]  ;;  %s3274_s6 = sld [smem:[#allocation2 + $0x13]] }
  0x5e   : > { %4431 = vst [vmem:[#allocation31_spill] sm:$0xff] %v3062_v62  ;;  %4432 = vst [vmem:[#allocation32_spill] sm:$0xff] %v3064_v63  ;;  %2346 = vmatprep.subr.bf16.mxu1 %v3070_v6  ;;  %v504_v21 = vand.u32 4294901760, %v350_v60  ;;  %v1355_v22 = vand.u32 4294901760, %v316_v1  ;;  %v1359_v27 = vand.u32 4294901760, %v318_v2  ;;  %v506_v29 = vand.u32 4294901760, %v353_v3 }
  0x5f   : > { %4433 = vst [vmem:[#allocation33_spill] sm:$0xff] %v3066_v4  ;;  %4434 = vst [vmem:[#allocation34_spill] sm:$0xff] %v3068_v5  ;;  %2538 = vmatprep.subr.bf16.mxu0 %v3077_v13  ;;  %v510_v30 = vand.u32 4294901760, %v355_v8  ;;  %v1361_v31 = vand.u32 4294901760, %v321_v10  ;;  %v1365_v32 = vand.u32 4294901760, %v323_v11  ;;  %v3088_v35 = vsub.f32 %v348_v59, %v500_v20  ;;  %v322_v44 = vld [vmem:[#allocation5 + $0x70] sm:$0xff] }
  0x60   : > { %4435 = vst [vmem:[#allocation35_spill] sm:$0xff] %v3070_v6  ;;  %4436 = vst [vmem:[#allocation36_spill] sm:$0xff] %v3072_v7  ;;  %v3086_v34 = vpack.c.bf16 %v504_v21, %v500_v20  ;;  %v3090_v36 = vsub.f32 %v350_v60, %v504_v21  ;;  %v3092_v37 = vpack.c.bf16 %v1359_v27, %v1355_v22  ;;  %v357_v55 = vld [vmem:[#allocation6 + $0x88] sm:$0xff]  ;;  %v359_v56 = vld [vmem:[#allocation6 + $0x98] sm:$0xff]  ;;  %v508_v0 = vand.u32 4294901760, %v352_v33  ;;  %s3286_s7 = sld [smem:[#allocation2 + $0x14]] }
  0x61   : > { %4437 = vst [vmem:[#allocation37_spill] sm:$0xff] %v3075_v12  ;;  %4438 = vst [vmem:[#allocation38_spill] sm:$0xff] %v3077_v13  ;;  %v3094_v45 = vsub.f32 %v316_v1, %v1355_v22  ;;  %v3096_v50 = vsub.f32 %v318_v2, %v1359_v27  ;;  %v3098_v52 = vpack.c.bf16 %v510_v30, %v506_v29  ;;  %v325_v57 = vld [vmem:[#allocation5 + $0x88] sm:$0xff]  ;;  %v512_v2 = vand.u32 4294901760, %v354_v38  ;;  %v327_v21 = vld [vmem:[#allocation5 + $0x98] sm:$0xff]  ;;  %s3289_s25 = sld [smem:[#allocation2 + $0x12]] }
  0x62   : > { %4439 = vst [vmem:[#allocation39_spill] sm:$0xff] %v3079_v14  ;;  %4440 = vst [vmem:[#allocation40_spill] sm:$0xff] %v3081_v15  ;;  %v3100_v54 = vsub.f32 %v353_v3, %v506_v29  ;;  %2348 = vmatpush1.bf16.msra.mxu1 %v3086_v34  ;;  %2540 = vmatpush1.bf16.msra.mxu0 %v3092_v37  ;;  %v3104_v58 = vsub.f32 %v355_v8, %v510_v30  ;;  %v1363_v3 = vand.u32 4294901760, %v320_v43  ;;  %v356_v30 = vld [vmem:[#allocation6 + $0x80] sm:$0xff]  ;;  %v358_v9 = vld [vmem:[#allocation6 + $0x90] sm:$0xff]  ;;  %s3291_s8 = sld [smem:[#allocation2 + $0x16]] }
  0x63   : > { %4441 = vst [vmem:[#allocation41_spill] sm:$0xff] %v3086_v34  ;;  %4442 = vst [vmem:[#allocation42_spill] sm:$0xff] %v3092_v37  ;;  %v3106_v59 = vpack.c.bf16 %v1365_v32, %v1361_v31  ;;  %v3108_v60 = vsub.f32 %v321_v10, %v1361_v31  ;;  %2350 = vmatprep.subr.bf16.mxu1 %v3098_v52  ;;  %v3111_v1 = vsub.f32 %v323_v11, %v1365_v32  ;;  %v324_v10 = vld [vmem:[#allocation5 + $0x80] sm:$0xff]  ;;  %v361_v34 = vld [vmem:[#allocation6 + $0xa8] sm:$0xff]  ;;  %s3303_s9 = sld [smem:[#allocation2 + $0x15]]  ;;  %s3305_s30 = sld [smem:[#allocation2 + $0x17]] }
  0x64   : > { %4443 = vst [vmem:[#allocation43_spill] sm:$0xff] %v3096_v50  ;;  %4444 = vst [vmem:[#allocation44_spill] sm:$0xff] %v3098_v52  ;;  %v1367_v20 = vand.u32 4294901760, %v322_v44  ;;  %v3114_v22 = vsub.f32 %v352_v33, %v508_v0  ;;  %v514_v27 = vand.u32 4294901760, %v357_v55  ;;  %v518_v8 = vand.u32 4294901760, %v359_v56  ;;  %v326_v52 = vld [vmem:[#allocation5 + $0x90] sm:$0xff] }
  0x65   : > { %4445 = vst [vmem:[#allocation45_spill] sm:$0xff] %v3100_v54  ;;  %4446 = vst [vmem:[#allocation46_spill] sm:$0xff] %v3104_v58  ;;  %2542 = vmatprep.subr.bf16.mxu0 %v3106_v59  ;;  %v1369_v29 = vand.u32 4294901760, %v325_v57  ;;  %v3116_v31 = vpack.c.bf16 %v512_v2, %v508_v0  ;;  %v3118_v37 = vsub.f32 %v354_v38, %v512_v2  ;;  %v363_v13 = vld [vmem:[#allocation6 + $0xb8] sm:$0xff]  ;;  %v1373_v38 = vand.u32 4294901760, %v327_v21  ;;  %v329_v48 = vld [vmem:[#allocation5 + $0xa8] sm:$0xff] }
  0x66   : > { %4447 = vst [vmem:[#allocation47_spill] sm:$0xff] %v3106_v59  ;;  %4448 = vst [vmem:[#allocation48_spill] sm:$0xff] %v3108_v60  ;;  %v3120_v11 = vpack.c.bf16 %v1367_v20, %v1363_v3  ;;  %v3122_v32 = vsub.f32 %v320_v43, %v1363_v3  ;;  %v3124_v59 = vsub.f32 %v322_v44, %v1367_v20  ;;  %v516_v43 = vand.u32 4294901760, %v356_v30  ;;  %v328_v46 = vld [vmem:[#allocation5 + $0xa0] sm:$0xff]  ;;  %v365_v16 = vld [vmem:[#allocation6 + $0xc8] sm:$0xff]  ;;  %s3307_s13 = sld [smem:[#allocation2 + $0x18]] }
  0x67   : > { %4449 = vst [vmem:[#allocation49_spill] sm:$0xff] %v3111_v1  ;;  %4450 = vst [vmem:[#allocation50_spill] sm:$0xff] %v3116_v31  ;;  %v3126_v33 = vpack.c.bf16 %v518_v8, %v514_v27  ;;  %v3128_v6 = vsub.f32 %v357_v55, %v514_v27  ;;  %v3130_v4 = vsub.f32 %v359_v56, %v518_v8  ;;  %2352 = vmatpush1.bf16.msra.mxu1 %v3116_v31  ;;  %v331_v55 = vld [vmem:[#allocation5 + $0xb8] sm:$0xff]  ;;  %v362_v31 = vld [vmem:[#allocation6 + $0xb0] sm:$0xff]  ;;  %s3350_s14 = sld [smem:[#allocation2 + $0x11]] }
  0x68   : > { %4451 = vst [vmem:[#allocation51_spill] sm:$0xff] %v3120_v11  ;;  %2544 = vmatpush1.bf16.msra.mxu0 %v3120_v11  ;;  %v3134_v0 = vsub.f32 %v325_v57, %v1369_v29  ;;  %v520_v2 = vand.u32 4294901760, %v358_v9  ;;  %v1371_v3 = vand.u32 4294901760, %v324_v10  ;;  %v1375_v44 = vand.u32 4294901760, %v326_v52  ;;  %v360_v57 = vld [vmem:[#allocation6 + $0xa0] sm:$0xff] }
  0x69   : > { %4452 = vst [vmem:[#allocation52_spill] sm:$0xff] %v3126_v33  ;;  %4453 = vst [vmem:[#allocation53_spill] sm:$0xff] %v3128_v6  ;;  %2354 = vmatprep.subr.bf16.mxu1 %v3126_v33  ;;  %v522_v20 = vand.u32 4294901760, %v361_v34  ;;  %v526_v61 = vand.u32 4294901760, %v363_v13  ;;  %v3137_v27 = vpack.c.bf16 %v1373_v38, %v1369_v29  ;;  %v3139_v56 = vsub.f32 %v327_v21, %v1373_v38  ;;  %v330_v29 = vld [vmem:[#allocation5 + $0xb0] sm:$0xff]  ;;  %v367_v21 = vld [vmem:[#allocation6 + $0xd8] sm:$0xff] }
  0x6a   : > { %4454 = vst [vmem:[#allocation54_spill] sm:$0xff] %v3134_v0  ;;  %v3141_v8 = vpack.c.bf16 %v520_v2, %v516_v43  ;;  %v3143_v11 = vsub.f32 %v356_v30, %v516_v43  ;;  %v3145_v39 = vsub.f32 %v358_v9, %v520_v2  ;;  %v3147_v33 = vpack.c.bf16 %v1375_v44, %v1371_v3  ;;  %v371_v0 = vld [vmem:[#allocation6 + $0xf8] sm:$0xff] }
  0x6b   : > { %4455 = vst [vmem:[#allocation55_spill] sm:$0xff] %v3137_v27  ;;  %4456 = vst [vmem:[#allocation56_spill] sm:$0xff] %v3139_v56  ;;  %v3149_v25 = vsub.f32 %v324_v10, %v1371_v3  ;;  %v3151_v23 = vsub.f32 %v326_v52, %v1375_v44  ;;  %2546 = vmatprep.subr.bf16.mxu0 %v3137_v27  ;;  %v3155_v30 = vpack.c.bf16 %v526_v61, %v522_v20  ;;  %v334_v56 = vld [vmem:[#allocation5 + $0xd0] sm:$0xff] }
  0x6c   : > { %4457 = vst [vmem:[#allocation57_spill] sm:$0xff] %v3141_v8  ;;  %4458 = vst [vmem:[#allocation58_spill] sm:$0xff] %v3143_v11  ;;  %2356 = vmatpush1.bf16.msra.mxu1 %v3141_v8  ;;  %v3157_v38 = vsub.f32 %v361_v34, %v522_v20  ;;  %v3159_v43 = vsub.f32 %v363_v13, %v526_v61  ;;  %v1377_v9 = vand.u32 4294901760, %v329_v48  ;;  %2548 = vmatpush1.bf16.msra.mxu0 %v3147_v33  ;;  %v335_v61 = vld [vmem:[#allocation5 + $0xd8] sm:$0xff] }
  0x6d   : > { %4459 = vst [vmem:[#allocation59_spill] sm:$0xff] %v3145_v39  ;;  %4460 = vst [vmem:[#allocation60_spill] sm:$0xff] %v3147_v33  ;;  %v1381_v10 = vand.u32 4294901760, %v331_v55  ;;  %v524_v52 = vand.u32 4294901760, %v360_v57  ;;  %v528_v2 = vand.u32 4294901760, %v362_v31  ;;  %v1379_v3 = vand.u32 4294901760, %v328_v46  ;;  %2358 = vmatprep.subr.bf16.mxu1 %v3155_v30 }
  0x6e   : > { %4461 = vst [vmem:[#allocation61_spill] sm:$0xff] %v3149_v25  ;;  %4462 = vst [vmem:[#allocation62_spill] sm:$0xff] %v3151_v23  ;;  %v3164_v44 = vsub.f32 %v329_v48, %v1377_v9  ;;  %v1383_v27 = vand.u32 4294901760, %v330_v29  ;;  %v530_v8 = vand.u32 4294901760, %v365_v16  ;;  %v534_v23 = vand.u32 4294901760, %v367_v21  ;;  %v333_v25 = vld [vmem:[#allocation5 + $0xc8] sm:$0xff] }
  0x6f   : > { %4463 = vst [vmem:[#allocation63_spill] sm:$0xff] %v3155_v30  ;;  %4464 = vst [vmem:[#allocation64_spill] sm:$0xff] %v3157_v38  ;;  %v3166_v13 = vpack.c.bf16 %v1381_v10, %v1377_v9  ;;  %v3168_v34 = vsub.f32 %v331_v55, %v1381_v10  ;;  %v3170_v20 = vpack.c.bf16 %v528_v2, %v524_v52  ;;  %v366_v38 = vld [vmem:[#allocation6 + $0xd0] sm:$0xff]  ;;  %v332_v30 = vld [vmem:[#allocation5 + $0xc0] sm:$0xff] }
  0x70   : > { %4465 = vst [vmem:[#allocation65_spill] sm:$0xff] %v3159_v43  ;;  %4466 = vst [vmem:[#allocation66_spill] sm:$0xff] %v3164_v44  ;;  %v3172_v33 = vsub.f32 %v360_v57, %v524_v52  ;;  %v364_v43 = vld [vmem:[#allocation6 + $0xc0] sm:$0xff]  ;;  %v3174_v48 = vsub.f32 %v362_v31, %v528_v2  ;;  %v3176_v44 = vpack.c.bf16 %v1383_v27, %v1379_v3  ;;  %v369_v9 = vld [vmem:[#allocation6 + $0xe8] sm:$0xff]  ;;  %v536_v10 = vand.u32 4294901760, %v366_v38 }
  0x71   : > { %4467 = vst [vmem:[#allocation67_spill] sm:$0xff] %v3166_v13  ;;  %4468 = vst [vmem:[#allocation68_spill] sm:$0xff] %v3168_v34  ;;  %v3178_v39 = vsub.f32 %v328_v46, %v1379_v3  ;;  %v3180_v11 = vsub.f32 %v330_v29, %v1383_v27  ;;  %2550 = vmatprep.subr.bf16.mxu0 %v3166_v13  ;;  %2360 = vmatpush1.bf16.msra.mxu1 %v3170_v20  ;;  %v1385_v46 = vand.u32 4294901760, %v333_v25  ;;  %v337_v2 = vld [vmem:[#allocation5 + $0xe8] sm:$0xff]  ;;  %v339_v3 = vld [vmem:[#allocation5 + $0xf8] sm:$0xff] }
  0x72   : > { %4469 = vst [vmem:[#allocation69_spill] sm:$0xff] %v3170_v20  ;;  %4470 = vst [vmem:[#allocation70_spill] sm:$0xff] %v3172_v33  ;;  %v3189_v55 = vpack.c.bf16 %v534_v23, %v530_v8  ;;  %v3191_v31 = vsub.f32 %v365_v16, %v530_v8  ;;  %v3193_v57 = vsub.f32 %v367_v21, %v534_v23  ;;  %2552 = vmatpush1.bf16.msra.mxu0 %v3176_v44 }
  0x73   : > { %4471 = vst [vmem:[#allocation71_spill] sm:$0xff] %v3176_v44  ;;  %4472 = vst [vmem:[#allocation72_spill] sm:$0xff] %v3178_v39  ;;  %v1389_v27 = vand.u32 4294901760, %v335_v61  ;;  %v532_v29 = vand.u32 4294901760, %v364_v43  ;;  %v1387_v52 = vand.u32 4294901760, %v332_v30  ;;  %v3203_v16 = vsub.f32 %v333_v25, %v1385_v46  ;;  %v336_v39 = vld [vmem:[#allocation5 + $0xe0] sm:$0xff] }
  0x74   : > { %4473 = vst [vmem:[#allocation73_spill] sm:$0xff] %v3180_v11  ;;  %4474 = vst [vmem:[#allocation74_spill] sm:$0xff] %v3189_v55  ;;  %2362 = vmatprep.subr.bf16.mxu1 %v3189_v55  ;;  %v1391_v23 = vand.u32 4294901760, %v334_v56  ;;  %v538_v8 = vand.u32 4294901760, %v369_v9  ;;  %v542_v21 = vand.u32 4294901760, %v371_v0  ;;  %v370_v11 = vld [vmem:[#allocation6 + $0xf0] sm:$0xff]  ;;  %v3216_v25 = vsub.f32 %v366_v38, %v536_v10 }
  0x75   : > { %4475 = vst [vmem:[#allocation75_spill] sm:$0xff] %v3191_v31  ;;  %4476 = vst [vmem:[#allocation76_spill] sm:$0xff] %v3193_v57  ;;  %v3205_v20 = vpack.c.bf16 %v1389_v27, %v1385_v46  ;;  %v3207_v13 = vsub.f32 %v335_v61, %v1389_v27  ;;  %v3209_v44 = vpack.c.bf16 %v536_v10, %v532_v29  ;;  %v368_v31 = vld [vmem:[#allocation6 + $0xe0] sm:$0xff]  ;;  %v338_v61 = vld [vmem:[#allocation5 + $0xf0] sm:$0xff]  ;;  %v544_v38 = vand.u32 4294901760, %v370_v11 }
  0x76   : > { %4477 = vst [vmem:[#allocation77_spill] sm:$0xff] %v3203_v16  ;;  %v3211_v57 = vsub.f32 %v364_v43, %v532_v29  ;;  %v3218_v55 = vpack.c.bf16 %v1391_v23, %v1387_v52  ;;  %v3220_v16 = vsub.f32 %v332_v30, %v1387_v52  ;;  %v3222_v46 = vsub.f32 %v334_v56, %v1391_v23 }
  0x77   : > { %4478 = vst [vmem:[#allocation78_spill] sm:$0xff] %v3205_v20  ;;  %4479 = vst [vmem:[#allocation79_spill] sm:$0xff] %v3209_v44  ;;  %2554 = vmatprep.subr.bf16.mxu0 %v3205_v20  ;;  %2364 = vmatpush1.bf16.msra.mxu1 %v3209_v44  ;;  %v3226_v43 = vpack.c.bf16 %v542_v21, %v538_v8  ;;  %v3228_v27 = vsub.f32 %v369_v9, %v538_v8  ;;  %v1397_v56 = vand.u32 4294901760, %v339_v3 }
  0x78   : > { %4480 = vst [vmem:[#allocation80_spill] sm:$0xff] %v3211_v57  ;;  %4481 = vst [vmem:[#allocation81_spill] sm:$0xff] %v3218_v55  ;;  %v3230_v29 = vsub.f32 %v371_v0, %v542_v21  ;;  %v1393_v57 = vand.u32 4294901760, %v337_v2  ;;  %2556 = vmatpush1.bf16.msra.mxu0 %v3218_v55  ;;  %v540_v30 = vand.u32 4294901760, %v368_v31  ;;  %v1395_v10 = vand.u32 4294901760, %v336_v39 }
  0x79   : > { %4482 = vst [vmem:[#allocation82_spill] sm:$0xff] %v3226_v43  ;;  %2366 = vmatprep.subr.bf16.mxu1 %v3226_v43  ;;  %v1399_v9 = vand.u32 4294901760, %v338_v61  ;;  %v3254_v21 = vsub.f32 %v339_v3, %v1397_v56  ;;  %v4272_v3 = vand.u32 4294901760, %v3022_v19 }
  0x7a   : > { %v3243_v0 = vsub.f32 %v337_v2, %v1393_v57  ;;  %v3252_v8 = vpack.c.bf16 %v1397_v56, %v1393_v57  ;;  %v3256_v55 = vpack.c.bf16 %v544_v38, %v540_v30  ;;  %v3258_v43 = vsub.f32 %v368_v31, %v540_v30  ;;  %v372_v56 = vld [vmem:[%s273_s15] sm:$0xff]  ;;  %s2336_s15 = sshll.u32 %s4774_s22, 4 }
  0x7b   : > { %v3264_v2 = vsub.f32 %v370_v11, %v544_v38  ;;  %v3266_v23 = vpack.c.bf16 %v1399_v9, %v1395_v10  ;;  %v3268_v52 = vsub.f32 %v336_v39, %v1395_v10  ;;  %v3270_v44 = vsub.f32 %v338_v61, %v1399_v9  ;;  %v373_v30 = vld [vmem:[%s277_s20] sm:$0xff]  ;;  %s282_s19 = scalar_lea.vmem %s4188_s5, %s2336_s15 }
  0x7c   : > { %4483 = vst [vmem:[#allocation83_spill] sm:$0xff] %v3252_v8  ;;  %4484 = vst [vmem:[#allocation84_spill] sm:$0xff] %v3256_v55  ;;  %2558 = vmatprep.subr.bf16.mxu0 %v3252_v8  ;;  %2368 = vmatpush1.bf16.msra.mxu1 %v3256_v55  ;;  %v4489_v11 = vand.u32 4294901760, %v3018_v17  ;;  %v4490_v39 = vand.u32 4294901760, %v3020_v18  ;;  %v374_v38 = vstv %s3195_s23  ;;  %v376_v10 = vstv %s3197_s26  ;;  %s3310_s23 = sld [smem:[#allocation2 + $0xd]]  ;;  %s3312_s26 = sld [smem:[#allocation2 + $0xb]] }
  0x7d   : > { %4485 = vst [vmem:[#allocation85_spill] sm:$0xff] %v3264_v2  ;;  %4486 = vst [vmem:[#allocation86_spill] sm:$0xff] %v3266_v23  ;;  %2560 = vmatpush1.bf16.msra.mxu0 %v3266_v23  ;;  %v379_v9 = vstv %s3214_s10  ;;  %v1448_v61 = vsub.f32 %v3022_v19, %v4272_v3  ;;  %v4491_v8 = vand.u32 4294901760, %v3026_v24  ;;  %v375_v23 = vmul.f32 %v374_v38, %v372_v56  ;;  %s3317_s10 = sld [smem:[#allocation2 + $0xf]] }
  0x7e   : > { %4487 = vst [vmem:[#allocation87_spill] sm:$0xff] %v3268_v52  ;;  %4488 = vst [vmem:[#allocation88_spill] sm:$0xff] %v3270_v44  ;;  %v593_v31 = vsub.f32 %v3018_v17, %v4489_v11  ;;  %v605_v57 = vsub.f32 %v3020_v18, %v4490_v39  ;;  %v381_v11 = vstv %s3200_s28  ;;  %v377_v18 = vmul.f32 %v376_v10, %v373_v30  ;;  %s3314_s28 = sld [smem:[#allocation2 + $0xc]] }
  0x7f   : > { %v1460_v20 = vsub.f32 %v3026_v24, %v4491_v8  ;;  %v1449_v19 = vand.u32 4294901760, %v1448_v61  ;;  %v386_v10 = vstv %s3234_s12  ;;  %v389_v61 = vstv %s3262_s27  ;;  %s3346_s12 = sld [smem:[#allocation2 + $0x10]] }
  0x80   : > { %v594_v39 = vand.u32 4294901760, %v593_v31  ;;  %v606_v55 = vand.u32 4294901760, %v605_v57  ;;  %v382_v31 = vmul.f32 %v381_v11, %v372_v56  ;;  %v383_v57 = vstv %s3232_s11  ;;  %s3344_s11 = sld [smem:[#allocation2 + $0xe]] }
  0x81   : > { %v1461_v8 = vand.u32 4294901760, %v1460_v20  ;;  %v384_v24 = vmul.f32 %v383_v57, %v373_v30  ;;  %v378_v38 = vadd.f32 %v377_v18, %v375_v23  ;;  %v391_v30 = vstv %s3272_s29 }
  0x82   : > { %v2369_v3 = vpack.c.bf16 %v606_v55, %v594_v39  ;;  %v394_v11 = vstv %s3260_s24  ;;  %v397_v39 = vstv %s3250_s21  ;;  %v4299_v52 = vand.u32 4294901760, %v3054_v51 }
  0x83   : > { %v2561_v56 = vpack.c.bf16 %v1461_v8, %v1449_v19  ;;  %v385_v55 = vadd.f32 %v384_v24, %v382_v31  ;;  %v3320_v20 = vadd.f32 %v379_v9, %v378_v38  ;;  %v4280_v9 = vand.u32 4294901760, %v3030_v26 }
  0x84   : > { %2370 = vmatprep.subr.bf16.mxu1 %v2369_v3 }
  0x85   : > { %2562 = vmatprep.subr.bf16.mxu0 %v2561_v56  ;;  %v387_v18 = vadd.f32 %v386_v10, %v385_v55  ;;  %v388_v3 = vmul.f32 %v3320_v20, %v3320_v20  ;;  %v4283_v56 = vand.u32 4294901760, %v3033_v28  ;;  %v599_v55 = vsub.f32 %v3030_v26, %v4280_v9 }
  0x86   : > { %v4286_v10 = vand.u32 4294901760, %v3039_v40  ;;  %v4294_v26 = vand.u32 4294901760, %v3043_v42 }
  0x87   : > { %v403_v31 = vmul.f32 0.63661975, %v387_v18  ;;  %v390_v44 = vmul.f32 %v389_v61, %v388_v3  ;;  %v611_v19 = vsub.f32 %v3033_v28, %v4283_v56  ;;  %v600_v23 = vand.u32 4294901760, %v599_v55 }
  0x88   : > { %v1454_v28 = vsub.f32 %v3039_v40, %v4286_v10  ;;  %v617_v10 = vsub.f32 %v3043_v42, %v4294_v26  ;;  %v4492_v40 = vand.u32 4294901760, %v3047_v47  ;;  %v4573_v42 = vld [vmem:[#allocation16_spill] sm:$0xff] }
  0x89   : > { %v404_v57 = vadd.f32 0.5, %v403_v31  ;;  %v392_v24 = vadd.f32 %v391_v30, %v390_v44  ;;  %v612_v17 = vand.u32 4294901760, %v611_v19  ;;  %v4290_v31 = vand.u32 4294901760, %v3041_v41 }
  0x8a   : > { %v1455_v19 = vand.u32 4294901760, %v1454_v28 }
  0x8b   : > { %v405_v9 = vfloor.f32 %v404_v57  ;;  %v393_v56 = vmul.f32 %v392_v24, %v388_v3  ;;  %v3361_v61 = vpack.c.bf16 %v612_v17, %v600_v23  ;;  %v1466_v24 = vsub.f32 %v3041_v41, %v4290_v31 }
  0x8c   : > { %v4493_v17 = vand.u32 4294901760, %v3051_v49 }
  0x8d   : > { %v406_v30 = vmul.f32 1.5707964, %v405_v9  ;;  %v408_v55 = vmul.f32 -4.371139e-08, %v405_v9  ;;  %v2743_v8 = vtrunc.f32 %v405_v9  ;;  %v395_v57 = vadd.f32 %v394_v11, %v393_v56 }
  0x8e   : > { %v629_v9 = vsub.f32 %v3047_v47, %v4492_v40  ;;  %v1472_v11 = vsub.f32 %v3051_v49, %v4493_v17  ;;  %v1467_v23 = vand.u32 4294901760, %v1466_v24  ;;  %v618_v56 = vand.u32 4294901760, %v617_v10 }
  0x8f   : > { %v407_v38 = vsub.f32 %v387_v18, %v406_v30  ;;  %v2744_v44 = vcvt.f32.s32 %v2743_v8  ;;  %v396_v28 = vmul.f32 %v395_v57, %v388_v3 }
  0x90   : > { %v3381_v30 = vpack.c.bf16 %v1467_v23, %v1455_v19  ;;  %v630_v40 = vand.u32 4294901760, %v629_v9  ;;  %v1473_v24 = vand.u32 4294901760, %v1472_v11  ;;  %v4494_v9 = vstv %s3240_s16 }
  0x91   : > { %v3376_v31 = vsub.f32 %v407_v38, %v408_v55  ;;  %v436_v41 = vadd.s32 1, %v2744_v44  ;;  %v398_v18 = vadd.f32 %v397_v39, %v396_v28  ;;  %v428_v17 = vand.u32 1, %v2744_v44 }
  0x92   : > { %v432_v57 = vand.u32 2, %v2744_v44  ;;  %v3385_v49 = vpack.c.bf16 %v630_v40, %v618_v56  ;;  %v1484_v38 = vsub.f32 %v3054_v51, %v4299_v52  ;;  %v4300_v39 = vand.u32 4294901760, %v3056_v53 }
  0x93   : > { %v411_v47 = vmul.f32 %v3376_v31, %v3376_v31  ;;  %v399_v10 = vmul.f32 %v398_v18, %v388_v3  ;;  %v437_v23 = vand.u32 2, %v436_v41  ;;  %v4302_v56 = vand.u32 4294901760, %v3062_v62 }
  0x94   : > { %v1485_v2 = vand.u32 4294901760, %v1484_v38  ;;  %v623_v3 = vsub.f32 %v3056_v53, %v4300_v39  ;;  %v4301_v18 = vand.u32 4294901760, %v3064_v63  ;;  %vm3401_vm0 = vcmp.ne.s32.totalorder %v428_v17, 0 }
  0x95   : > { %v412_v55 = vmul.f32 -0.00019515296, %v411_v47  ;;  %v419_v28 = vmul.f32 2.4433157e-05, %v411_v47  ;;  %v423_v19 = vmul.f32 %v411_v47, %v411_v47  ;;  %v401_v8 = vadd.f32 %v4494_v9, %v399_v10 }
  0x96   : > { %v425_v26 = vmul.f32 0.5, %v411_v47  ;;  %v3405_v41 = vpack.c.bf16 %v1485_v2, %v1473_v24  ;;  %v624_v10 = vand.u32 4294901760, %v623_v3  ;;  %v4305_v38 = vand.u32 4294901760, %v3068_v5 }
  0x97   : > { %v413_v44 = vadd.f32 0.008332161, %v412_v55  ;;  %v420_v11 = vadd.f32 -0.0013887316, %v419_v28  ;;  %v3399_v40 = vmul.f32 %v401_v8, %v3320_v20  ;;  %v635_v55 = vsub.f32 %v3062_v62, %v4302_v56 }
  0x98   : > { %v1478_v20 = vsub.f32 %v3064_v63, %v4301_v18  ;;  %v1490_v8 = vsub.f32 %v3068_v5, %v4305_v38  ;;  %v4312_v2 = vand.u32 4294901760, %v3072_v7  ;;  %v4315_v17 = vand.u32 4294901760, %v3075_v12 }
  0x99   : > { %v414_v9 = vmul.f32 %v413_v44, %v411_v47  ;;  %v421_v39 = vmul.f32 %v420_v11, %v411_v47  ;;  %v4316_v24 = vand.u32 4294901760, %v3079_v14  ;;  %vm3420_vm1 = vcmp.ne.s32.totalorder %v432_v57, 0 }
  0x9a   : > { %vm3424_vm2 = vcmp.ne.s32.totalorder %v437_v23, 0  ;;  %v636_v18 = vand.u32 4294901760, %v635_v55  ;;  %v1479_v56 = vand.u32 4294901760, %v1478_v20  ;;  %v1491_v63 = vand.u32 4294901760, %v1490_v8 }
  0x9b   : > { %v415_v28 = vadd.f32 -0.16666655, %v414_v9  ;;  %v422_v3 = vadd.f32 0.041666646, %v421_v39  ;;  %v641_v38 = vsub.f32 %v3072_v7, %v4312_v2  ;;  %v653_v9 = vsub.f32 %v3075_v12, %v4315_v17  ;;  %v4561_v12 = vld [vmem:[#allocation61_spill] sm:$0xff] }
  0x9c   : > { %v1496_v57 = vsub.f32 %v3079_v14, %v4316_v24  ;;  %v3437_v5 = vpack.c.bf16 %v636_v18, %v624_v10  ;;  %v4317_v55 = vand.u32 4294901760, %v3081_v15  ;;  %v3440_v20 = vpack.c.bf16 %v1491_v63, %v1479_v56  ;;  %v4556_v14 = vld [vmem:[#allocation53_spill] sm:$0xff] }
  0x9d   : > { %v416_v39 = vmul.f32 %v415_v28, %v411_v47  ;;  %v424_v23 = vmul.f32 %v423_v19, %v422_v3  ;;  %v642_v8 = vand.u32 4294901760, %v641_v38  ;;  %v654_v62 = vand.u32 4294901760, %v653_v9 }
  0x9e   : > { %v1497_v53 = vand.u32 4294901760, %v1496_v57  ;;  %v1508_v17 = vsub.f32 %v3081_v15, %v4317_v55  ;;  %v4324_v24 = vand.u32 4294901760, %v3088_v35  ;;  %v4320_v19 = vand.u32 4294901760, %v3090_v36  ;;  %v4559_v15 = vld [vmem:[#allocation58_spill] sm:$0xff] }
  0x9f   : > { %v417_v2 = vmul.f32 %v416_v39, %v3376_v31  ;;  %v426_v7 = vsub.f32 %v424_v23, %v425_v26  ;;  %v3447_v47 = vpack.c.bf16 %v654_v62, %v642_v8  ;;  %v4319_v18 = vand.u32 4294901760, %v3094_v45 }
  0xa0   : > { %v4318_v63 = vand.u32 4294901760, %v3096_v50  ;;  %v1509_v38 = vand.u32 4294901760, %v1508_v17  ;;  %v647_v26 = vsub.f32 %v3088_v35, %v4324_v24  ;;  %v659_v28 = vsub.f32 %v3090_v36, %v4320_v19 }
  0xa1   : > { %v418_v56 = vadd.f32 %v417_v2, %v3376_v31  ;;  %v427_v10 = vadd.f32 1.0, %v426_v7  ;;  %v1502_v62 = vsub.f32 %v3094_v45, %v4319_v18  ;;  %v4323_v31 = vand.u32 4294901760, %v3100_v54 }
  0xa2   : > { %v1514_v3 = vsub.f32 %v3096_v50, %v4318_v63  ;;  %v3470_v17 = vpack.c.bf16 %v1509_v38, %v1497_v53  ;;  %v648_v9 = vand.u32 4294901760, %v647_v26  ;;  %v660_v23 = vand.u32 4294901760, %v659_v28 }
  0xa3   : > { %v430_v7 = vsel %vm3401_vm0, %v427_v10, %v418_v56  ;;  %v431_v2 = vsel %vm3401_vm0, %v418_v56, %v427_v10  ;;  %v1503_v8 = vand.u32 4294901760, %v1502_v62  ;;  %v665_v63 = vsub.f32 %v3100_v54, %v4323_v31 }
  0xa4   : > { %v434_v57 = vsub.f32 0.0, %v430_v7  ;;  %v439_v39 = vsub.f32 0.0, %v431_v2  ;;  %v1515_v55 = vand.u32 4294901760, %v1514_v3  ;;  %v4321_v18 = vand.u32 4294901760, %v3104_v58 }
  0xa5   : > { %v4322_v19 = vand.u32 4294901760, %v3108_v60  ;;  %v3481_v56 = vpack.c.bf16 %v660_v23, %v648_v9  ;;  %v4327_v10 = vand.u32 4294901760, %v3111_v1  ;;  %v666_v44 = vand.u32 4294901760, %v665_v63 }
  0xa6   : > { %v435_v53 = vsel %vm3420_vm1, %v434_v57, %v430_v7  ;;  %v440_v52 = vsel %vm3424_vm2, %v439_v39, %v431_v2  ;;  %v3486_v28 = vpack.c.bf16 %v1515_v55, %v1503_v8  ;;  %v677_v11 = vsub.f32 %v3104_v58, %v4321_v18 }
  0xa7   : > { %v441_v38 = vmul.f32 %v440_v52, %v3399_v40  ;;  %v442_v26 = vmul.f32 %v435_v53, %v3399_v40  ;;  %v1520_v62 = vsub.f32 %v3108_v60, %v4322_v19  ;;  %v1532_v40 = vsub.f32 %v3111_v1, %v4327_v10 }
  0xa8   : > { %v4501_v7 = vstv %s3286_s7  ;;  %v4502_v2 = vstv %s3291_s8  ;;  %v4503_v57 = vstv %s3310_s23  ;;  %v4504_v23 = vstv %s3317_s10 }
  0xa9   : > { %v443_v3 = vmul.f32 %v442_v26, %v441_v38  ;;  %v464_v63 = vmul.f32 %v4501_v7, %v441_v38  ;;  %v472_v9 = vmul.f32 %v4502_v2, %v442_v26  ;;  %v445_v39 = vmul.f32 %v4503_v57, %v441_v38 }
  0xaa   : > { %v453_v8 = vmul.f32 %v4504_v23, %v442_v26  ;;  %v678_v53 = vand.u32 4294901760, %v677_v11  ;;  %v1521_v52 = vand.u32 4294901760, %v1520_v62  ;;  %v1533_v18 = vand.u32 4294901760, %v1532_v40 }
  0xab   : > { %v4505_v19 = vstv %s3274_s6  ;;  %v4506_v24 = vstv %s3303_s9  ;;  %v4507_v10 = vstv %s3305_s30  ;;  %v4508_v1 = vstv %s3314_s28 }
  0xac   : > { %v466_v31 = vadd.f32 %v4505_v19, %v464_v63  ;;  %v474_v60 = vadd.f32 %v4506_v24, %v472_v9  ;;  %v478_v55 = vmul.f32 %v4507_v10, %v443_v3  ;;  %v447_v58 = vadd.f32 %v4508_v1, %v445_v39 }
  0xad   : > { %v4509_v7 = vstv %s3344_s11  ;;  %v4510_v2 = vstv %s3346_s12  ;;  %v3518_v57 = vpack.c.bf16 %v678_v53, %v666_v44  ;;  %v3520_v23 = vpack.c.bf16 %v1533_v18, %v1521_v52 }
  0xae   : > { %v455_v54 = vadd.f32 %v4509_v7, %v453_v8  ;;  %v459_v50 = vmul.f32 %v4510_v2, %v443_v3  ;;  %v467_v11 = vmul.f32 %v466_v31, %v441_v38  ;;  %v475_v62 = vmul.f32 %v474_v60, %v442_v26  ;;  %v4514_v2 = vld [vmem:[#allocation54_spill] sm:$0xff] }
  0xaf   : > { %v448_v40 = vmul.f32 %v447_v58, %v441_v38  ;;  %v4511_v19 = vand.u32 4294901760, %v3114_v22  ;;  %v4339_v10 = vand.u32 4294901760, %v3118_v37  ;;  %v4337_v1 = vand.u32 4294901760, %v3122_v32 }
  0xb0   : > { %v456_v63 = vmul.f32 %v455_v54, %v442_v26  ;;  %v4336_v9 = vand.u32 4294901760, %v3124_v59  ;;  %v4512_v39 = vstv %s3289_s25  ;;  %v4513_v44 = vstv %s3312_s26 }
  0xb1   : > { %v671_v24 = vsub.f32 %v3114_v22, %v4511_v19  ;;  %v469_v3 = vadd.f32 %v4512_v39, %v467_v11  ;;  %v450_v8 = vadd.f32 %v4513_v44, %v448_v40  ;;  %v4338_v31 = vand.u32 4294901760, %v3128_v6 }
  0xb2   : > { %v683_v58 = vsub.f32 %v3118_v37, %v4339_v10  ;;  %v1526_v54 = vsub.f32 %v3122_v32, %v4337_v1  ;;  %v1538_v60 = vsub.f32 %v3124_v59, %v4336_v9  ;;  %v4342_v26 = vand.u32 4294901760, %v3130_v4 }
  0xb3   : > { %v672_v18 = vand.u32 4294901760, %v671_v24  ;;  %v470_v53 = vmul.f32 %v469_v3, %v441_v38  ;;  %v451_v52 = vmul.f32 %v450_v8, %v441_v38  ;;  %v689_v7 = vsub.f32 %v3128_v6, %v4338_v31 }
  0xb4   : > { %v4343_v11 = vand.u32 4294901760, %v4514_v2  ;;  %v684_v40 = vand.u32 4294901760, %v683_v58  ;;  %v1527_v19 = vand.u32 4294901760, %v1526_v54  ;;  %v1539_v24 = vand.u32 4294901760, %v1538_v60  ;;  %v4515_v54 = vld [vmem:[#allocation56_spill] sm:$0xff] }
  0xb5   : > { %v701_v39 = vsub.f32 %v3130_v4, %v4342_v26  ;;  %v476_v44 = vadd.f32 %v475_v62, %v470_v53  ;;  %v457_v9 = vadd.f32 %v456_v63, %v451_v52  ;;  %v690_v1 = vand.u32 4294901760, %v689_v7  ;;  %v4516_v26 = vld [vmem:[#allocation58_spill] sm:$0xff]  ;;  %v4517_v52 = vld [vmem:[#allocation59_spill] sm:$0xff] }
  0xb6   : > { %v1544_v38 = vsub.f32 %v4514_v2, %v4343_v11  ;;  %v3553_v3 = vpack.c.bf16 %v684_v40, %v672_v18  ;;  %v3555_v8 = vpack.c.bf16 %v1539_v24, %v1527_v19  ;;  %v4344_v60 = vand.u32 4294901760, %v4515_v54  ;;  %v4518_v18 = vld [vmem:[#allocation61_spill] sm:$0xff] }
  0xb7   : > { %v702_v58 = vand.u32 4294901760, %v701_v39  ;;  %v479_v31 = vadd.f32 %v478_v55, %v476_v44  ;;  %v460_v10 = vadd.f32 %v459_v50, %v457_v9  ;;  %v4345_v62 = vand.u32 4294901760, %v4516_v26  ;;  %v4521_v55 = vld [vmem:[#allocation62_spill] sm:$0xff] }
  0xb8   : > { %v1545_v6 = vand.u32 4294901760, %v1544_v38  ;;  %v1556_v63 = vsub.f32 %v4515_v54, %v4344_v60  ;;  %v4347_v7 = vand.u32 4294901760, %v4517_v52  ;;  %v4348_v40 = vand.u32 4294901760, %v4518_v18 }
  0xb9   : > { %v3559_v53 = vpack.c.bf16 %v702_v58, %v690_v1  ;;  %v4519_v19 = vstv %s3307_s13  ;;  %v4520_v39 = vstv %s3350_s14  ;;  %v695_v50 = vsub.f32 %v4516_v26, %v4345_v62  ;;  %v4522_v58 = vld [vmem:[#allocation64_spill] sm:$0xff] }
  0xba   : > { %v481_v24 = vadd.f32 %v4519_v19, %v479_v31  ;;  %v462_v11 = vadd.f32 %v4520_v39, %v460_v10  ;;  %v4353_v9 = vand.u32 4294901760, %v4521_v55  ;;  %v1557_v1 = vand.u32 4294901760, %v1556_v63 }
  0xbb   : > { %v707_v44 = vsub.f32 %v4517_v52, %v4347_v7  ;;  %v1550_v38 = vsub.f32 %v4518_v18, %v4348_v40  ;;  %v4354_v60 = vand.u32 4294901760, %v4522_v58  ;;  %v696_v19 = vand.u32 4294901760, %v695_v50  ;;  %v4527_v50 = vld [vmem:[#allocation65_spill] sm:$0xff] }
  0xbc   : > { %v3581_v31 = vand.u32 4294901760, %v481_v24  ;;  %v3583_v10 = vand.u32 4294901760, %v462_v11  ;;  %v1562_v39 = vsub.f32 %v4521_v55, %v4353_v9  ;;  %v3588_v63 = vpack.c.bf16 %v1557_v1, %v1545_v6  ;;  %v4528_v6 = vld [vmem:[#allocation66_spill] sm:$0xff] }
  0xbd   : > { %v708_v62 = vand.u32 4294901760, %v707_v44  ;;  %v1551_v26 = vand.u32 4294901760, %v1550_v38  ;;  %v713_v7 = vsub.f32 %v4522_v58, %v4354_v60  ;;  %v4356_v54 = vand.u32 4294901760, %v4527_v50 }
  0xbe   : > { %4523 = vst [vmem:[#allocation89_spill] sm:$0xff] %v3581_v31  ;;  %4524 = vst [vmem:[#allocation90_spill] sm:$0xff] %v3583_v10  ;;  %v3594_v40 = vsub.f32 %v481_v24, %v3581_v31  ;;  %v3597_v18 = vsub.f32 %v462_v11, %v3583_v10  ;;  %v1563_v52 = vand.u32 4294901760, %v1562_v39  ;;  %v4359_v1 = vand.u32 4294901760, %v4528_v6 }
  0xbf   : > { %v3600_v2 = vpack.c.bf16 %v708_v62, %v696_v19  ;;  %v714_v9 = vand.u32 4294901760, %v713_v7  ;;  %v4362_v44 = vand.u32 4294901760, %v3168_v34  ;;  %v725_v11 = vsub.f32 %v4527_v50, %v4356_v54  ;;  %v4529_v54 = vld [vmem:[#allocation72_spill] sm:$0xff] }
  0xc0   : > { %4525 = vst [vmem:[#allocation91_spill] sm:$0xff] %v3594_v40  ;;  %4526 = vst [vmem:[#allocation92_spill] sm:$0xff] %v3597_v18  ;;  %v4367_v38 = vand.u32 4294901760, %v3594_v40  ;;  %v4368_v60 = vand.u32 4294901760, %v3597_v18  ;;  %v3606_v58 = vpack.c.bf16 %v1563_v52, %v1551_v26  ;;  %v1568_v62 = vsub.f32 %v4528_v6, %v4359_v1 }
  0xc1   : > { %v1580_v7 = vsub.f32 %v3168_v34, %v4362_v44  ;;  %v4373_v24 = vand.u32 4294901760, %v3172_v33  ;;  %v4377_v19 = vand.u32 4294901760, %v3174_v48  ;;  %v726_v39 = vand.u32 4294901760, %v725_v11 }
  0xc2   : > { %v582_v26 = vsub.f32 %v3594_v40, %v4367_v38  ;;  %v1437_v52 = vsub.f32 %v3597_v18, %v4368_v60  ;;  %v4384_v10 = vand.u32 4294901760, %v4529_v54  ;;  %v1569_v1 = vand.u32 4294901760, %v1568_v62  ;;  %v4530_v18 = vld [vmem:[#allocation73_spill] sm:$0xff] }
  0xc3   : > { %v1581_v31 = vand.u32 4294901760, %v1580_v7  ;;  %v719_v44 = vsub.f32 %v3172_v33, %v4373_v24  ;;  %v731_v34 = vsub.f32 %v3174_v48, %v4377_v19  ;;  %v3632_v38 = vpack.c.bf16 %v726_v39, %v714_v9  ;;  %v4531_v33 = vld [vmem:[#allocation75_spill] sm:$0xff]  ;;  %v4532_v19 = vld [vmem:[#allocation76_spill] sm:$0xff] }
  0xc4   : > { %v583_v6 = vand.u32 4294901760, %v582_v26  ;;  %v1438_v50 = vand.u32 4294901760, %v1437_v52  ;;  %v1574_v11 = vsub.f32 %v4529_v54, %v4384_v10  ;;  %v4383_v40 = vand.u32 4294901760, %v4530_v18  ;;  %v4533_v52 = vld [vmem:[#allocation77_spill] sm:$0xff] }
  0xc5   : > { %v3637_v60 = vpack.c.bf16 %v1581_v31, %v1569_v1  ;;  %v720_v62 = vand.u32 4294901760, %v719_v44  ;;  %v732_v7 = vand.u32 4294901760, %v731_v34  ;;  %v4379_v55 = vand.u32 4294901760, %v4531_v33 }
  0xc6   : > { %584 = vmatmul.mubr.f32.vlgmr.msra.gmra.mrb[0].mxu1 %v583_v6  ;;  %1439 = vmatmul.mubr.f32.vlgmr.msra.gmra.mrb[0].mxu0 %v1438_v50  ;;  %v1575_v24 = vand.u32 4294901760, %v1574_v11  ;;  %v4378_v26 = vand.u32 4294901760, %v4532_v19  ;;  %v4380_v9 = vand.u32 4294901760, %v4533_v52  ;;  %v1586_v34 = vsub.f32 %v4530_v18, %v4383_v40  ;;  %v4534_v50 = vld [vmem:[#allocation80_spill] sm:$0xff] }
  0xc7   : > { %2372 = vmatpush1.bf16.msra.mxu1 %v3361_v61  ;;  %2564 = vmatpush1.bf16.msra.mxu0 %v3381_v30  ;;  %v3645_v39 = vpack.c.bf16 %v732_v7, %v720_v62  ;;  %v4381_v31 = vand.u32 4294901760, %v3207_v13  ;;  %v4382_v6 = vand.u32 4294901760, %v4534_v50  ;;  %v737_v61 = vsub.f32 %v4531_v33, %v4379_v55 }
  0xc8   : > { %2374 = vmatprep.subr.bf16.mxu1 %v3385_v49  ;;  %2566 = vmatprep.subr.bf16.mxu0 %v3405_v41  ;;  %v749_v30 = vsub.f32 %v4532_v19, %v4378_v26  ;;  %v1592_v1 = vsub.f32 %v4533_v52, %v4380_v9  ;;  %v4391_v44 = vand.u32 4294901760, %v3216_v25  ;;  %v1587_v11 = vand.u32 4294901760, %v1586_v34 }
  0xc9   : > { %v1604_v49 = vsub.f32 %v3207_v13, %v4381_v31  ;;  %v743_v41 = vsub.f32 %v4534_v50, %v4382_v6  ;;  %v4389_v62 = vand.u32 4294901760, %v3220_v16  ;;  %v4535_v7 = vmov 0.0  }
  0xca   : > { %814 = vmatprep.mubr.f32.mxu1 %v4535_v7  ;;  %1669 = vmatprep.mubr.f32.mxu0 %v4535_v7  ;;  %v738_v26 = vand.u32 4294901760, %v737_v61  ;;  %v750_v55 = vand.u32 4294901760, %v749_v30  ;;  %v1593_v9 = vand.u32 4294901760, %v1592_v1  ;;  %v755_v34 = vsub.f32 %v3216_v25, %v4391_v44  ;;  %v4554_v7 = vld [vmem:[#allocation48_spill] sm:$0xff] }
  0xcb   : > { %2376 = vmatpush1.bf16.msra.mxu1 %v3437_v5  ;;  %2568 = vmatpush1.bf16.msra.mxu0 %v3440_v20  ;;  %v3678_v31 = vpack.c.bf16 %v1587_v11, %v1575_v24  ;;  %v1605_v6 = vand.u32 4294901760, %v1604_v49  ;;  %v744_v40 = vand.u32 4294901760, %v743_v41  ;;  %v1598_v10 = vsub.f32 %v3220_v16, %v4389_v62 }
  0xcc   : > { %2378 = vmatprep.subr.bf16.mxu1 %v3447_v47  ;;  %2570 = vmatprep.subr.bf16.mxu0 %v3470_v17  ;;  %v3685_v61 = vpack.c.bf16 %v750_v55, %v738_v26  ;;  %v756_v30 = vand.u32 4294901760, %v755_v34  ;;  %v4387_v1 = vand.u32 4294901760, %v3222_v46  ;;  %v4386_v5 = vand.u32 4294901760, %v3228_v27 }
  0xcd   : > { %v3689_v20 = vpack.c.bf16 %v1605_v6, %v1593_v9  ;;  %v1599_v24 = vand.u32 4294901760, %v1598_v10  ;;  %v4385_v11 = vand.u32 4294901760, %v3230_v29  ;;  %v4388_v49 = vand.u32 4294901760, %v3243_v0  ;;  %v4537_v9 = vld [vmem:[#allocation85_spill] sm:$0xff] }
  0xce   : > { %v3693_v41 = vpack.c.bf16 %v756_v30, %v744_v40  ;;  %v1610_v47 = vsub.f32 %v3222_v46, %v4387_v1  ;;  %v761_v17 = vsub.f32 %v3228_v27, %v4386_v5  ;;  %v4390_v55 = vand.u32 4294901760, %v3254_v21  ;;  %v4538_v30 = vld [vmem:[#allocation87_spill] sm:$0xff] }
  0xcf   : > { %2380 = vmatpush1.bf16.msra.mxu1 %v3481_v56  ;;  %2572 = vmatpush1.bf16.msra.mxu0 %v3486_v28  ;;  %v773_v10 = vsub.f32 %v3230_v29, %v4385_v11  ;;  %v1616_v40 = vsub.f32 %v3243_v0, %v4388_v49  ;;  %v4394_v26 = vand.u32 4294901760, %v3258_v43  ;;  %v4392_v6 = vand.u32 4294901760, %v4537_v9 }
  0xd0   : > { %4536 = vst [vmem:[#allocation72_spill] sm:$0xff] %v3693_v41  ;;  %2382 = vmatprep.subr.bf16.mxu1 %v3518_v57  ;;  %2574 = vmatprep.subr.bf16.mxu0 %v3520_v23  ;;  %v1611_v34 = vand.u32 4294901760, %v1610_v47  ;;  %v762_v56 = vand.u32 4294901760, %v761_v17  ;;  %v1628_v28 = vsub.f32 %v3254_v21, %v4390_v55  ;;  %v4393_v11 = vand.u32 4294901760, %v4538_v30  ;;  %v4539_v17 = vld [vmem:[#allocation88_spill] sm:$0xff]  ;;  %v4543_v41 = vld [vmem:[#allocation22_spill] sm:$0xff] }
  0xd1   : > { %v774_v5 = vand.u32 4294901760, %v773_v10  ;;  %v1617_v1 = vand.u32 4294901760, %v1616_v40  ;;  %v767_v49 = vsub.f32 %v3258_v43, %v4394_v26  ;;  %v779_v57 = vsub.f32 %v4537_v9, %v4392_v6  ;;  %v4541_v26 = vld [vmem:[#allocation19_spill] sm:$0xff] }
  0xd2   : > { %v2587_v62 = vpack.c.bf16 %v1611_v34, %v1599_v24  ;;  %v1629_v23 = vand.u32 4294901760, %v1628_v28  ;;  %v1622_v47 = vsub.f32 %v4538_v30, %v4393_v11  ;;  %v4397_v55 = vand.u32 4294901760, %v4539_v17  ;;  %v4540_v11 = vld [vmem:[#allocation18_spill] sm:$0xff] }
  0xd3   : > { %2384 = vmatpush1.bf16.msra.mxu1 %v3553_v3  ;;  %2576 = vmatpush1.bf16.msra.mxu0 %v3555_v8  ;;  %v2397_v10 = vpack.c.bf16 %v774_v5, %v762_v56  ;;  %v768_v40 = vand.u32 4294901760, %v767_v49  ;;  %v780_v44 = vand.u32 4294901760, %v779_v57  ;;  %v4553_v8 = vld [vmem:[#allocation46_spill] sm:$0xff]  ;;  %v4566_v49 = vld [vmem:[#allocation68_spill] sm:$0xff]  ;;  %v4574_v5 = vand.u32 4294901760, %v3088_v35 }
  0xd4   : > { %2386 = vmatprep.subr.bf16.mxu1 %v3559_v53  ;;  %2578 = vmatprep.subr.bf16.mxu0 %v3588_v63  ;;  %v2589_v6 = vpack.c.bf16 %v1629_v23, %v1617_v1  ;;  %v1623_v24 = vand.u32 4294901760, %v1622_v47  ;;  %v1634_v34 = vsub.f32 %v4539_v17, %v4397_v55  ;;  %v4551_v55 = vld [vmem:[#allocation43_spill] sm:$0xff]  ;;  %v4555_v47 = vld [vmem:[#allocation49_spill] sm:$0xff]  ;;  %v4563_v1 = vld [vmem:[#allocation64_spill] sm:$0xff] }
  0xd5   : > { %v2399_v28 = vpack.c.bf16 %v780_v44, %v768_v40  ;;  %v4560_v63 = vld [vmem:[#allocation59_spill] sm:$0xff]  ;;  %v4564_v40 = vld [vmem:[#allocation65_spill] sm:$0xff]  ;;  %v4572_v44 = vld [vmem:[#allocation14_spill] sm:$0xff]  ;;  %v4578_v57 = vand.u32 4294901760, %v4551_v55 }
  0xd6   : > { %v1635_v56 = vand.u32 4294901760, %v1634_v34  ;;  %v4565_v34 = vld [vmem:[#allocation66_spill] sm:$0xff]  ;;  %v2593_v51 = vpack.c.bf16 %v4573_v42, %v4572_v44  ;;  %v4583_v42 = vand.u32 4294901760, %v4554_v7  ;;  %v4584_v44 = vand.u32 4294901760, %v4555_v47 }
  0xd7   : > { %2388 = vmatpush1.bf16.msra.mxu1 %v3600_v2  ;;  %2580 = vmatpush1.bf16.msra.mxu0 %v3606_v58  ;;  %v4552_v2 = vld [vmem:[#allocation45_spill] sm:$0xff]  ;;  %v4562_v58 = vld [vmem:[#allocation62_spill] sm:$0xff]  ;;  %v4569_v30 = vld [vmem:[#allocation72_spill] sm:$0xff] }
  0xd8   : > { %2390 = vmatprep.subr.bf16.mxu1 %v3632_v38  ;;  %2582 = vmatprep.subr.bf16.mxu0 %v3637_v60  ;;  %v2591_v23 = vpack.c.bf16 %v1635_v56, %v1623_v24  ;;  %v4557_v60 = vld [vmem:[#allocation54_spill] sm:$0xff]  ;;  %v4558_v24 = vld [vmem:[#allocation56_spill] sm:$0xff]  ;;  %v4568_v56 = vld [vmem:[#allocation87_spill] sm:$0xff] }
  0xd9   : > { %v4567_v38 = vld [vmem:[#allocation70_spill] sm:$0xff] }
  0xdb   : > { %2392 = vmatpush1.bf16.msra.mxu1 %v3645_v39  ;;  %2584 = vmatpush1.bf16.msra.mxu0 %v3678_v31  ;;  %v4570_v31 = vld [vmem:[#allocation12_spill] sm:$0xff]  ;;  %v4571_v39 = vld [vmem:[#allocation13_spill] sm:$0xff] }
  0xdc   : > { %2394 = vmatprep.subr.bf16.mxu1 %v3685_v61  ;;  %2586 = vmatprep.subr.bf16.mxu0 %v3689_v20  ;;  %v2401_v53 = vpack.c.bf16 %v4571_v39, %v4570_v31  ;;  %v4575_v61 = vand.u32 4294901760, %v3090_v36  ;;  %v4577_v20 = vand.u32 4294901760, %v3094_v45  ;;  %v3830_v39 = vpack.c.bf16 %v4584_v44, %v4583_v42 }
  0xdd   : > { %v4595_v42 = vand.u32 4294901760, %v4557_v60  ;;  %v4596_v44 = vand.u32 4294901760, %v4558_v24 }
  0xde   : > { %v3812_v3 = vpack.c.bf16 %v4575_v61, %v4574_v5  ;;  %4585 = vst [vmem:[#allocation77_spill] sm:$0xff] %v3830_v39  ;;  %v4586_v5 = vand.u32 4294901760, %v3114_v22  ;;  %v4587_v61 = vand.u32 4294901760, %v3118_v37  ;;  %v4656_v39 = vld [vmem:[#allocation32_spill] sm:$0xff] }
  0xdf   : > { %2396 = vmatpush1.bf16.msra.mxu1 %v4569_v30  ;;  %2588 = vmatpush1.bf16.msra.mxu0 %v2587_v62  ;;  %v3818_v30 = vpack.c.bf16 %v4578_v57, %v4577_v20  ;;  %v4580_v62 = vand.u32 4294901760, %v4552_v2  ;;  %v4589_v57 = vand.u32 4294901760, %v3122_v32  ;;  %v4590_v20 = vand.u32 4294901760, %v3124_v59 }
  0xe0   : > { %2398 = vmatprep.subr.bf16.mxu1 %v2397_v10  ;;  %2590 = vmatprep.subr.bf16.mxu0 %v2589_v6  ;;  %4576 = vst [vmem:[#allocation73_spill] sm:$0xff] %v3812_v3  ;;  %v4581_v6 = vand.u32 4294901760, %v4553_v8  ;;  %v3836_v3 = vpack.c.bf16 %v4587_v61, %v4586_v5  ;;  %v3854_v5 = vpack.c.bf16 %v4596_v44, %v4595_v42  ;;  %v4598_v61 = vand.u32 4294901760, %v4559_v15 }
  0xe1   : > { %4579 = vst [vmem:[#allocation75_spill] sm:$0xff] %v3818_v30  ;;  %v3842_v30 = vpack.c.bf16 %v4590_v20, %v4589_v57  ;;  %v4601_v20 = vand.u32 4294901760, %v4561_v12  ;;  %v4607_v42 = vand.u32 4294901760, %v4565_v34  ;;  %v4608_v44 = vand.u32 4294901760, %v4566_v49 }
  0xe2   : > { %v3824_v10 = vpack.c.bf16 %v4581_v6, %v4580_v62  ;;  %4588 = vst [vmem:[#allocation80_spill] sm:$0xff] %v3836_v3  ;;  %v4592_v62 = vand.u32 4294901760, %v4556_v14  ;;  %v4593_v6 = vand.u32 4294901760, %v3130_v4  ;;  %4597 = vst [vmem:[#allocation18_spill] sm:$0xff] %v3854_v5  ;;  %v4599_v3 = vand.u32 4294901760, %v4560_v63 }
  0xe3   : > { %4591 = vst [vmem:[#allocation85_spill] sm:$0xff] %v3842_v30  ;;  %2400 = vmatpush1.bf16.msra.mxu1 %v2399_v28  ;;  %2592 = vmatpush1.bf16.msra.mxu0 %v2591_v23  ;;  %v4602_v30 = vand.u32 4294901760, %v4562_v58  ;;  %v4604_v28 = vand.u32 4294901760, %v4563_v1  ;;  %v4605_v23 = vand.u32 4294901760, %v4564_v40 }
  0xe4   : > { %4582 = vst [vmem:[#allocation76_spill] sm:$0xff] %v3824_v10  ;;  %v3848_v10 = vpack.c.bf16 %v4593_v6, %v4592_v62  ;;  %v3860_v57 = vpack.c.bf16 %v4599_v3, %v4598_v61  ;;  %2402 = vmatprep.subr.bf16.mxu1 %v2401_v53  ;;  %2594 = vmatprep.subr.bf16.mxu0 %v2593_v51  ;;  %v4610_v61 = vand.u32 4294901760, %v4567_v38  ;;  %v4613_v51 = vand.u32 4294901760, %v4529_v54 }
  0xe5   : > { %v3866_v62 = vpack.c.bf16 %v4602_v30, %v4601_v20  ;;  %v3872_v6 = vpack.c.bf16 %v4605_v23, %v4604_v28  ;;  %v3878_v3 = vpack.c.bf16 %v4608_v44, %v4607_v42  ;;  %v4614_v53 = vand.u32 4294901760, %v4530_v18 }
  0xe6   : > { %4594 = vst [vmem:[#allocation88_spill] sm:$0xff] %v3848_v10  ;;  %4600 = vst [vmem:[#allocation19_spill] sm:$0xff] %v3860_v57  ;;  %v4611_v57 = vand.u32 4294901760, %v3174_v48  ;;  %v4616_v28 = vand.u32 4294901760, %v4531_v33  ;;  %v4617_v23 = vand.u32 4294901760, %v4532_v19  ;;  %v4619_v42 = vand.u32 4294901760, %v4533_v52 }
  0xe7   : > { %4603 = vst [vmem:[#allocation22_spill] sm:$0xff] %v3866_v62  ;;  %4606 = vst [vmem:[#allocation43_spill] sm:$0xff] %v3872_v6  ;;  %v3890_v20 = vpack.c.bf16 %v4614_v53, %v4613_v51  ;;  %v4620_v44 = vand.u32 4294901760, %v3207_v13  ;;  %v4625_v51 = vld [vmem:[#allocation89_spill] sm:$0xff]  ;;  %v4626_v53 = vld [vmem:[#allocation90_spill] sm:$0xff] }
  0xe8   : > { %4609 = vst [vmem:[#allocation45_spill] sm:$0xff] %v3878_v3  ;;  %v3884_v30 = vpack.c.bf16 %v4611_v57, %v4610_v61  ;;  %v3896_v6 = vpack.c.bf16 %v4617_v23, %v4616_v28  ;;  %v4622_v57 = vand.u32 4294901760, %v4534_v50  ;;  %v4623_v61 = vand.u32 4294901760, %v3216_v25  ;;  %816 = vmatmul.mubr.f32.vlgmr.msra.gmra.mrb[0].mxu1 %v4625_v51  ;;  %1671 = vmatmul.mubr.f32.vlgmr.msra.gmra.mrb[0].mxu0 %v4626_v53  ;;  %v4637_v51 = vld [vmem:[#allocation21_spill] sm:$0xff]  ;;  %v4649_v62 = vld [vmem:[#allocation27_spill] sm:$0xff]  ;;  %v4655_v10 = vld [vmem:[#allocation34_spill] sm:$0xff] }
  0xe9   : > { %4615 = vst [vmem:[#allocation48_spill] sm:$0xff] %v3890_v20  ;;  %v3902_v3 = vpack.c.bf16 %v4620_v44, %v4619_v42  ;;  %v4627_v20 = vand.u32 4294901760, %v3220_v16  ;;  %v4628_v28 = vand.u32 4294901760, %v3222_v46  ;;  %v4631_v42 = vand.u32 4294901760, %v3230_v29 }
  0xea   : > { %4612 = vst [vmem:[#allocation46_spill] sm:$0xff] %v3884_v30  ;;  %4618 = vst [vmem:[#allocation49_spill] sm:$0xff] %v3896_v6  ;;  %v3908_v30 = vpack.c.bf16 %v4623_v61, %v4622_v57  ;;  %v4630_v6 = vand.u32 4294901760, %v3228_v27  ;;  %v4634_v57 = vand.u32 4294901760, %v3254_v21  ;;  %v4636_v53 = vpack.c.bf16 %v4541_v26, %v4540_v11 }
  0xeb   : > { %4621 = vst [vmem:[#allocation53_spill] sm:$0xff] %v3902_v3  ;;  %v3916_v23 = vpack.c.bf16 %v4628_v28, %v4627_v20  ;;  %v4633_v3 = vand.u32 4294901760, %v3243_v0  ;;  %v4638_v20 = vpack.c.bf16 %v4543_v41, %v4637_v51  ;;  %v4639_v28 = vand.u32 4294901760, %v3258_v43 }
  0xec   : > { %4624 = vst [vmem:[#allocation54_spill] sm:$0xff] %v3908_v30  ;;  %v3922_v44 = vpack.c.bf16 %v4631_v42, %v4630_v6  ;;  %2404 = vmatpush1.bf16.msra.mxu1 %v4636_v53  ;;  %v4642_v42 = vand.u32 4294901760, %v4568_v56  ;;  %v4648_v53 = vld [vmem:[#allocation28_spill] sm:$0xff] }
  0xed   : > { %4629 = vst [vmem:[#allocation56_spill] sm:$0xff] %v3916_v23  ;;  %v3928_v61 = vpack.c.bf16 %v4634_v57, %v4633_v3  ;;  %2596 = vmatpush1.bf16.msra.mxu0 %v4638_v20  ;;  %v4640_v23 = vand.u32 4294901760, %v4537_v9  ;;  %v4645_v57 = vld [vmem:[#allocation25_spill] sm:$0xff]  ;;  %v4650_v5 = vpack.c.bf16 %v4648_v53, %v4649_v62  ;;  %v4651_v20 = vmov 0.0  }
  0xee   : > { %4632 = vst [vmem:[#allocation58_spill] sm:$0xff] %v3922_v44  ;;  %v4643_v44 = vand.u32 4294901760, %v4539_v17  ;;  %950 = vmatprep.mubr.f32.mxu1 %v4651_v20  ;;  %1805 = vmatprep.mubr.f32.mxu0 %v4651_v20 }
  0xef   : > { %4635 = vst [vmem:[#allocation59_spill] sm:$0xff] %v3928_v61  ;;  %v3940_v6 = vpack.c.bf16 %v4640_v23, %v4639_v28  ;;  %v4646_v61 = vld [vmem:[#allocation23_spill] sm:$0xff]  ;;  %2598 = vmatprep.subr.bf16.mxu0 %v4650_v5  ;;  %v4653_v28 = vld [vmem:[#allocation29_spill] sm:$0xff]  ;;  %v4664_v5 = vpack.c.bf16 %v3090_v36, %v3088_v35  ;;  %v4669_v35 = vpack.c.bf16 %v3124_v59, %v3122_v32 }
  0xf0   : > { %v3946_v3 = vpack.c.bf16 %v4643_v44, %v4642_v42  ;;  %v4647_v30 = vpack.c.bf16 %v4645_v57, %v4646_v61  ;;  %v4652_v23 = vld [vmem:[#allocation31_spill] sm:$0xff]  ;;  %v4657_v44 = vpack.c.bf16 %v4655_v10, %v4656_v39  ;;  %v4658_v42 = vld [vmem:[#allocation37_spill] sm:$0xff]  ;;  %v4670_v36 = vpack.c.bf16 %v3130_v4, %v4556_v14 }
  0xf1   : > { %4641 = vst [vmem:[#allocation61_spill] sm:$0xff] %v3940_v6  ;;  %v4654_v6 = vpack.c.bf16 %v4652_v23, %v4653_v28  ;;  %v4662_v61 = vld [vmem:[#allocation39_spill] sm:$0xff]  ;;  %v4665_v23 = vpack.c.bf16 %v4551_v55, %v3094_v45  ;;  %v4671_v45 = vpack.c.bf16 %v4558_v24, %v4557_v60  ;;  %v4674_v59 = vpack.c.bf16 %v4564_v40, %v4563_v1  ;;  %v4697_v55 = vld [vmem:[#allocation38_spill] sm:$0xff]  ;;  %v4710_v60 = vld [vmem:[#allocation69_spill] sm:$0xff] }
  0xf2   : > { %4644 = vst [vmem:[#allocation62_spill] sm:$0xff] %v3946_v3  ;;  %2406 = vmatprep.subr.bf16.mxu1 %v4647_v30  ;;  %2600 = vmatpush1.bf16.msra.mxu0 %v4657_v44  ;;  %v4659_v3 = vld [vmem:[#allocation36_spill] sm:$0xff]  ;;  %v4667_v44 = vpack.c.bf16 %v4555_v47, %v4554_v7  ;;  %v4672_v7 = vpack.c.bf16 %v4560_v63, %v4559_v15  ;;  %v4702_v63 = vld [vmem:[#allocation50_spill] sm:$0xff]  ;;  %v4703_v1 = vld [vmem:[#allocation51_spill] sm:$0xff] }
  0xf3   : > { %2408 = vmatpush1.bf16.msra.mxu1 %v4654_v6  ;;  %v4660_v57 = vpack.c.bf16 %v4658_v42, %v4659_v3  ;;  %v4661_v30 = vld [vmem:[#allocation40_spill] sm:$0xff]  ;;  %v4666_v6 = vpack.c.bf16 %v4553_v8, %v4552_v2  ;;  %v4675_v4 = vpack.c.bf16 %v4566_v49, %v4565_v34  ;;  %v4676_v14 = vpack.c.bf16 %v3174_v48, %v4567_v38  ;;  %v4701_v49 = vld [vmem:[#allocation47_spill] sm:$0xff]  ;;  %v4706_v34 = vld [vmem:[#allocation57_spill] sm:$0xff] }
  0xf4   : > { %v4663_v53 = vpack.c.bf16 %v4661_v30, %v4662_v61  ;;  %v4677_v15 = vpack.c.bf16 %v4530_v18, %v4529_v54  ;;  %v4680_v32 = vpack.c.bf16 %v3216_v25, %v4534_v50  ;;  %v4681_v48 = vpack.c.bf16 %v3222_v46, %v3220_v16  ;;  %v4686_v18 = vld [vmem:[#allocation11_spill] sm:$0xff]  ;;  %v4700_v8 = vld [vmem:[#allocation44_spill] sm:$0xff] }
  0xf5   : > { %2410 = vmatprep.subr.bf16.mxu1 %v4660_v57  ;;  %v4668_v57 = vpack.c.bf16 %v3118_v37, %v3114_v22  ;;  %v4673_v37 = vpack.c.bf16 %v4562_v58, %v4561_v12  ;;  %v4678_v12 = vpack.c.bf16 %v4532_v19, %v4531_v33  ;;  %v4679_v22 = vpack.c.bf16 %v3207_v13, %v4533_v52  ;;  %v4687_v16 = vld [vmem:[#allocation15_spill] sm:$0xff]  ;;  %v4694_v19 = vld [vmem:[#allocation30_spill] sm:$0xff]  ;;  %v4695_v52 = vld [vmem:[#allocation33_spill] sm:$0xff] }
  0xf6   : > { %2602 = vmatprep.subr.bf16.mxu0 %v4663_v53  ;;  %v4682_v54 = vpack.c.bf16 %v3230_v29, %v3228_v27  ;;  %v4683_v33 = vpack.c.bf16 %v3254_v21, %v3243_v0  ;;  %v4684_v13 = vpack.c.bf16 %v4537_v9, %v3258_v43  ;;  %v4685_v25 = vpack.c.bf16 %v4539_v17, %v4568_v56  ;;  %v4688_v46 = vld [vmem:[#allocation91_spill] sm:$0xff]  ;;  %v4689_v27 = vld [vmem:[#allocation92_spill] sm:$0xff]  ;;  %v4690_v29 = vld [vmem:[#allocation17_spill] sm:$0xff] }
  0xf7   : > { %2412 = vmatpush1.bf16.msra.mxu1 %v4664_v5  ;;  %2604 = vmatpush1.bf16.msra.mxu0 %v4665_v23  ;;  %v4691_v0 = vld [vmem:[#allocation20_spill] sm:$0xff]  ;;  %v4693_v43 = vld [vmem:[#allocation26_spill] sm:$0xff]  ;;  %v4696_v50 = vld [vmem:[#allocation35_spill] sm:$0xff] }
  0xf8   : > { %2414 = vmatprep.subr.bf16.mxu1 %v4666_v6  ;;  %2606 = vmatprep.subr.bf16.mxu0 %v4667_v44  ;;  %v4692_v21 = vld [vmem:[#allocation24_spill] sm:$0xff]  ;;  %v4698_v9 = vld [vmem:[#allocation41_spill] sm:$0xff]  ;;  %v4699_v17 = vld [vmem:[#allocation42_spill] sm:$0xff] }
  0xf9   : > { %v4704_v47 = vld [vmem:[#allocation52_spill] sm:$0xff]  ;;  %v4705_v40 = vld [vmem:[#allocation55_spill] sm:$0xff]  ;;  %v4712_v56 = vld [vmem:[#allocation74_spill] sm:$0xff] }
  0xfa   : > { %v4707_v2 = vld [vmem:[#allocation60_spill] sm:$0xff]  ;;  %v4708_v58 = vld [vmem:[#allocation63_spill] sm:$0xff]  ;;  %v4713_v53 = vld [vmem:[#allocation78_spill] sm:$0xff] }
  0xfb   : > { %2416 = vmatpush1.bf16.msra.mxu1 %v4668_v57  ;;  %2608 = vmatpush1.bf16.msra.mxu0 %v4669_v35  ;;  %v4709_v38 = vld [vmem:[#allocation67_spill] sm:$0xff]  ;;  %v4715_v5 = vld [vmem:[#allocation81_spill] sm:$0xff]  ;;  %v4716_v6 = vld [vmem:[#allocation82_spill] sm:$0xff]  ;;  %v4718_v57 = vand.u32 4294901760, %v4570_v31  ;;  %v4730_v31 = vand.u32 4294901760, %v4543_v41  ;;  %v4740_v41 = vand.u32 4294901760, %v4653_v28 }
  0xfc   : > { %2418 = vmatprep.subr.bf16.mxu1 %v4670_v36  ;;  %2610 = vmatprep.subr.bf16.mxu0 %v4671_v45  ;;  %v4711_v24 = vld [vmem:[#allocation71_spill] sm:$0xff]  ;;  %v4719_v35 = vld [vmem:[#allocation13_spill] sm:$0xff] }
  0xfd   : > { %v4714_v23 = vld [vmem:[#allocation79_spill] sm:$0xff]  ;;  %v4720_v36 = vand.u32 4294901760, %v4719_v35 }
  0xfe   : > { %v4717_v44 = vld [vmem:[#allocation83_spill] sm:$0xff] }
  0xff   : > { %2420 = vmatpush1.bf16.msra.mxu1 %v4672_v7  ;;  %2612 = vmatpush1.bf16.msra.mxu0 %v4673_v37  ;;  %v2465_v45 = vpack.c.bf16 %v4720_v36, %v4718_v57  ;;  %v4721_v7 = vld [vmem:[#allocation14_spill] sm:$0xff]  ;;  %v4733_v57 = vld [vmem:[#allocation25_spill] sm:$0xff] }
 0x100   : > { %2422 = vmatprep.subr.bf16.mxu1 %v4674_v59  ;;  %2614 = vmatprep.subr.bf16.mxu0 %v4675_v4  ;;  %v4722_v37 = vand.u32 4294901760, %v4721_v7  ;;  %v4723_v59 = vld [vmem:[#allocation16_spill] sm:$0xff]  ;;  %v4734_v35 = vand.u32 4294901760, %v4733_v57  ;;  %v4735_v7 = vand.u32 4294901760, %v4649_v62  ;;  %v4744_v62 = vand.u32 4294901760, %v4655_v10  ;;  %v4750_v10 = vld [vmem:[#allocation75_spill] sm:$0xff] }
 0x101   : > { %v4724_v4 = vand.u32 4294901760, %v4723_v59  ;;  %v4758_v57 = vld [vmem:[#allocation22_spill] sm:$0xff] }
 0x103   : > { %2424 = vmatpush1.bf16.msra.mxu1 %v4676_v14  ;;  %2616 = vmatpush1.bf16.msra.mxu0 %v4677_v15  ;;  %v2657_v14 = vpack.c.bf16 %v4724_v4, %v4722_v37  ;;  %v4725_v15 = vld [vmem:[#allocation84_spill] sm:$0xff] }
 0x104   : > { %2426 = vmatprep.subr.bf16.mxu1 %v4678_v12  ;;  %2618 = vmatprep.subr.bf16.mxu0 %v4679_v22  ;;  %v4726_v12 = vld [vmem:[#allocation86_spill] sm:$0xff]  ;;  %v4727_v22 = vand.u32 4294901760, %v4540_v11  ;;  %v4736_v37 = vld [vmem:[#allocation28_spill] sm:$0xff] }
 0x105   : > { %v4737_v59 = vand.u32 4294901760, %v4736_v37  ;;  %v4762_v37 = vld [vmem:[#allocation48_spill] sm:$0xff] }
 0x107   : > { %2428 = vmatpush1.bf16.msra.mxu1 %v4680_v32  ;;  %2620 = vmatpush1.bf16.msra.mxu0 %v4681_v48  ;;  %v4728_v32 = vand.u32 4294901760, %v4541_v26  ;;  %v2661_v11 = vpack.c.bf16 %v4737_v59, %v4735_v7  ;;  %v4738_v26 = vand.u32 4294901760, %v4688_v46  ;;  %v4761_v7 = vld [vmem:[#allocation46_spill] sm:$0xff]  ;;  %v4763_v59 = vld [vmem:[#allocation49_spill] sm:$0xff] }
 0x108   : > { %2430 = vmatprep.subr.bf16.mxu1 %v4682_v54  ;;  %2622 = vmatprep.subr.bf16.mxu0 %v4683_v33  ;;  %v4729_v54 = vand.u32 4294901760, %v4637_v51  ;;  %v4739_v51 = vand.u32 4294901760, %v4689_v27 }
 0x109   : > { %v2467_v48 = vpack.c.bf16 %v4728_v32, %v4727_v22  ;;  %v4743_v22 = vand.u32 4294901760, %v4656_v39  ;;  %v4749_v39 = vld [vmem:[#allocation73_spill] sm:$0xff] }
 0x10a   : > { %v2659_v33 = vpack.c.bf16 %v4730_v31, %v4729_v54  ;;  %v4746_v54 = vand.u32 4294901760, %v4658_v42  ;;  %v4748_v31 = vand.u32 4294901760, %v4661_v30  ;;  %v4752_v42 = vld [vmem:[#allocation77_spill] sm:$0xff] }
 0x10b   : > { %2432 = vmatpush1.bf16.msra.mxu1 %v4684_v13  ;;  %2624 = vmatpush1.bf16.msra.mxu0 %v4685_v25  ;;  %v4731_v13 = vld [vmem:[#allocation23_spill] sm:$0xff]  ;;  %v2663_v32 = vpack.c.bf16 %v4744_v62, %v4743_v22  ;;  %v4754_v30 = vld [vmem:[#allocation85_spill] sm:$0xff]  ;;  %v4772_v62 = vld [vmem:[#allocation90_spill] sm:$0xff] }
 0x10c   : > { %2434 = vmatprep.subr.bf16.mxu1 %v4686_v18  ;;  %2626 = vmatprep.subr.bf16.mxu0 %v4687_v16  ;;  %v4732_v25 = vand.u32 4294901760, %v4731_v13  ;;  %v4756_v13 = vld [vmem:[#allocation18_spill] sm:$0xff]  ;;  %v4771_v22 = vld [vmem:[#allocation89_spill] sm:$0xff] }
 0x10e   : > { %953 = vmatmul.mubr.f32.vlgmr.msra.gmra.mrb[0].mxu1 %v4688_v46  ;;  %1808 = vmatmul.mubr.f32.vlgmr.msra.gmra.mrb[0].mxu0 %v4689_v27  ;;  %v2469_v36 = vpack.c.bf16 %v4734_v35, %v4732_v25  ;;  %v4745_v46 = vand.u32 4294901760, %v4659_v3  ;;  %v4751_v3 = vld [vmem:[#allocation76_spill] sm:$0xff]  ;;  %v4757_v25 = vld [vmem:[#allocation19_spill] sm:$0xff] }
 0x10f   : > { %2436 = vmatpush1.bf16.msra.mxu1 %v4690_v29  ;;  %2628 = vmatpush1.bf16.msra.mxu0 %v4691_v0  ;;  %v4759_v35 = vld [vmem:[#allocation43_spill] sm:$0xff] }
 0x110   : > { %2438 = vmatprep.subr.bf16.mxu1 %v4692_v21  ;;  %2630 = vmatprep.subr.bf16.mxu0 %v4693_v43  ;;  %v2473_v27 = vpack.c.bf16 %v4746_v54, %v4745_v46 }
 0x111   : > { %1055 = vmatprep.mubr.f32.mxu1 %v4651_v20  ;;  %1910 = vmatprep.mubr.f32.mxu0 %v4651_v20 }
 0x113   : > { %2440 = vmatpush1.bf16.msra.mxu1 %v4694_v19  ;;  %2632 = vmatpush1.bf16.msra.mxu0 %v4695_v52 }
 0x114   : > { %2442 = vmatprep.subr.bf16.mxu1 %v4696_v50  ;;  %2634 = vmatprep.subr.bf16.mxu0 %v4697_v55 }
 0x117   : > { %2444 = vmatpush1.bf16.msra.mxu1 %v4698_v9  ;;  %2636 = vmatpush1.bf16.msra.mxu0 %v4699_v17 }
 0x118   : > { %2446 = vmatprep.subr.bf16.mxu1 %v4700_v8  ;;  %2638 = vmatprep.subr.bf16.mxu0 %v4701_v49 }
 0x11b   : > { %2448 = vmatpush1.bf16.msra.mxu1 %v4702_v63  ;;  %2640 = vmatpush1.bf16.msra.mxu0 %v4703_v1 }
 0x11c   : > { %2450 = vmatprep.subr.bf16.mxu1 %v4704_v47  ;;  %2642 = vmatprep.subr.bf16.mxu0 %v4705_v40 }
 0x11f   : > { %2452 = vmatpush1.bf16.msra.mxu1 %v4706_v34  ;;  %2644 = vmatpush1.bf16.msra.mxu0 %v4707_v2 }
 0x120   : > { %2454 = vmatprep.subr.bf16.mxu1 %v4708_v58  ;;  %2646 = vmatprep.subr.bf16.mxu0 %v4709_v38 }
 0x123   : > { %2456 = vmatpush1.bf16.msra.mxu1 %v4710_v60  ;;  %2648 = vmatpush1.bf16.msra.mxu0 %v4711_v24 }
 0x124   : > { %2458 = vmatprep.subr.bf16.mxu1 %v4712_v56  ;;  %2650 = vmatprep.subr.bf16.mxu0 %v4713_v53 }
 0x127   : > { %2460 = vmatpush1.bf16.msra.mxu1 %v4714_v23  ;;  %2652 = vmatpush1.bf16.msra.mxu0 %v4715_v5 }
 0x128   : > { %2462 = vmatprep.subr.bf16.mxu1 %v4716_v6  ;;  %2654 = vmatprep.subr.bf16.mxu0 %v4717_v44 }
 0x12b   : > { %2464 = vmatpush1.bf16.msra.mxu1 %v4725_v15  ;;  %2656 = vmatpush1.bf16.msra.mxu0 %v4726_v12 }
 0x12c   : > { %2466 = vmatprep.subr.bf16.mxu1 %v2465_v45  ;;  %2658 = vmatprep.subr.bf16.mxu0 %v2657_v14  ;;  %v4741_v45 = vld [vmem:[#allocation31_spill] sm:$0xff] }
 0x12d   : > { %v4742_v4 = vand.u32 4294901760, %v4741_v45  ;;  %v4768_v45 = vld [vmem:[#allocation59_spill] sm:$0xff] }
 0x12e   : > { %1059 = vmatmul.mubr.f32.vlgmr.msra.gmra.mrb[0].mxu1 %v4738_v26  ;;  %1914 = vmatmul.mubr.f32.vlgmr.msra.gmra.mrb[0].mxu0 %v4739_v51  ;;  %v4765_v26 = vld [vmem:[#allocation54_spill] sm:$0xff]  ;;  %v4766_v51 = vld [vmem:[#allocation56_spill] sm:$0xff] }
 0x12f   : > { %2468 = vmatpush1.bf16.msra.mxu1 %v2467_v48  ;;  %2660 = vmatpush1.bf16.msra.mxu0 %v2659_v33  ;;  %v2471_v14 = vpack.c.bf16 %v4742_v4, %v4740_v41  ;;  %v4747_v48 = vand.u32 4294901760, %v4662_v61  ;;  %v4753_v61 = vld [vmem:[#allocation80_spill] sm:$0xff]  ;;  %v4767_v41 = vld [vmem:[#allocation58_spill] sm:$0xff]  ;;  %v4769_v4 = vld [vmem:[#allocation61_spill] sm:$0xff] }
 0x130   : > { %2470 = vmatprep.subr.bf16.mxu1 %v2469_v36  ;;  %2662 = vmatprep.subr.bf16.mxu0 %v2661_v11  ;;  %v4755_v33 = vld [vmem:[#allocation88_spill] sm:$0xff]  ;;  %v4760_v36 = vld [vmem:[#allocation45_spill] sm:$0xff] }
 0x131   : > { %v2665_v28 = vpack.c.bf16 %v4748_v31, %v4747_v48  ;;  %1225 = vmatprep.mubr.f32.mxu1 %v4651_v20  ;;  %2080 = vmatprep.mubr.f32.mxu0 %v4651_v20  ;;  %v4764_v11 = vld [vmem:[#allocation53_spill] sm:$0xff] }
 0x133   : > { %2472 = vmatpush1.bf16.msra.mxu1 %v2471_v14  ;;  %2664 = vmatpush1.bf16.msra.mxu0 %v2663_v32  ;;  %v4770_v14 = vld [vmem:[#allocation62_spill] sm:$0xff] }
 0x134   : > { %2474 = vmatprep.subr.bf16.mxu1 %v2473_v27  ;;  %2666 = vmatprep.subr.bf16.mxu0 %v2665_v28 }
 0x137   : > { %2476 = vmatpush1.bf16.msra.mxu1 %v4749_v39  ;;  %2668 = vmatpush1.bf16.msra.mxu0 %v4750_v10 }
 0x138   : > { %2478 = vmatprep.subr.bf16.mxu1 %v4751_v3  ;;  %2670 = vmatprep.subr.bf16.mxu0 %v4752_v42 }
 0x13b   : > { %2480 = vmatpush1.bf16.msra.mxu1 %v4753_v61  ;;  %2672 = vmatpush1.bf16.msra.mxu0 %v4754_v30 }
 0x13c   : > { %2482 = vmatprep.subr.bf16.mxu1 %v4755_v33  ;;  %2674 = vmatprep.subr.bf16.mxu0 %v4756_v13 }
 0x13f   : > { %2484 = vmatpush1.bf16.msra.mxu1 %v4757_v25  ;;  %2676 = vmatpush1.bf16.msra.mxu0 %v4758_v57 }
 0x140   : > { %2486 = vmatprep.subr.bf16.mxu1 %v4759_v35  ;;  %2678 = vmatprep.subr.bf16.mxu0 %v4760_v36 }
 0x143   : > { %2488 = vmatpush1.bf16.msra.mxu1 %v4761_v7  ;;  %2680 = vmatpush1.bf16.msra.mxu0 %v4762_v37 }
 0x144   : > { %2490 = vmatprep.subr.bf16.mxu1 %v4763_v59  ;;  %2682 = vmatprep.subr.bf16.mxu0 %v4764_v11 }
 0x147   : > { %2492 = vmatpush1.bf16.msra.mxu1 %v4765_v26  ;;  %2684 = vmatpush1.bf16.msra.mxu0 %v4766_v51 }
 0x148   : > { %2494 = vmatprep.subr.bf16.mxu1 %v4767_v41  ;;  %2686 = vmatprep.subr.bf16.mxu0 %v4768_v45 }
 0x14b   : > { %2496 = vmatpush1.bf16.msra.mxu1 %v4769_v4  ;;  %2688 = vmatpush1.bf16.msra.mxu0 %v4770_v14 }
 0x14c   : > { %2498 = vmatprep.subr.bf16.mxu1 %v4686_v18  ;;  %2690 = vmatprep.subr.bf16.mxu0 %v4687_v16 }
 0x14e   : > { %1227 = vmatmul.mubr.f32.vlgmr.msra.gmra.mrb[0].mxu1 %v4771_v22  ;;  %2082 = vmatmul.mubr.f32.vlgmr.msra.gmra.mrb[0].mxu0 %v4772_v62 }
 0x14f   : > { %2500 = vmatpush1.bf16.msra.mxu1 %v4690_v29  ;;  %2692 = vmatpush1.bf16.msra.mxu0 %v4691_v0 }
 0x150   : > { %2502 = vmatprep.subr.bf16.mxu1 %v4692_v21  ;;  %2694 = vmatprep.subr.bf16.mxu0 %v4693_v43 }
 0x151   : > { %1329 = vmatprep.mubr.f32.mxu1 %v4651_v20  ;;  %2184 = vmatprep.mubr.f32.mxu0 %v4651_v20 }
 0x153   : > { %2504 = vmatpush1.bf16.msra.mxu1 %v4694_v19  ;;  %2696 = vmatpush1.bf16.msra.mxu0 %v4695_v52 }
 0x154   : > { %2506 = vmatprep.subr.bf16.mxu1 %v4696_v50  ;;  %2698 = vmatprep.subr.bf16.mxu0 %v4697_v55 }
 0x157   : > { %2508 = vmatpush1.bf16.msra.mxu1 %v4698_v9  ;;  %2700 = vmatpush1.bf16.msra.mxu0 %v4699_v17 }
 0x158   : > { %2510 = vmatprep.subr.bf16.mxu1 %v4700_v8  ;;  %2702 = vmatprep.subr.bf16.mxu0 %v4701_v49 }
 0x15b   : > { %2512 = vmatpush1.bf16.msra.mxu1 %v4702_v63  ;;  %2704 = vmatpush1.bf16.msra.mxu0 %v4703_v1 }
 0x15c   : > { %2514 = vmatprep.subr.bf16.mxu1 %v4704_v47  ;;  %2706 = vmatprep.subr.bf16.mxu0 %v4705_v40 }
 0x15f   : > { %2516 = vmatpush1.bf16.msra.mxu1 %v4706_v34  ;;  %2708 = vmatpush1.bf16.msra.mxu0 %v4707_v2 }
 0x160   : > { %2518 = vmatprep.subr.bf16.mxu1 %v4708_v58  ;;  %2710 = vmatprep.subr.bf16.mxu0 %v4709_v38 }
 0x163   : > { %2520 = vmatpush1.bf16.msra.mxu1 %v4710_v60  ;;  %2712 = vmatpush1.bf16.msra.mxu0 %v4711_v24 }
 0x164   : > { %2522 = vmatprep.subr.bf16.mxu1 %v4712_v56  ;;  %2714 = vmatprep.subr.bf16.mxu0 %v4713_v53 }
 0x167   : > { %2524 = vmatpush1.bf16.msra.mxu1 %v4714_v23  ;;  %2716 = vmatpush1.bf16.msra.mxu0 %v4715_v5 }
 0x168   : > { %2526 = vmatprep.subr.bf16.mxu1 %v4716_v6  ;;  %2718 = vmatprep.subr.bf16.mxu0 %v4717_v44 }
 0x16b   : > { %2528 = vmatpush1.bf16.msra.mxu1 %v4725_v15  ;;  %2720 = vmatpush1.bf16.msra.mxu0 %v4726_v12 }
 0x16e   : > { %1331 = vmatmul.mubr.f32.vlgmr.msra.gmra.mrb[0].mxu1 %v4771_v22  ;;  %2186 = vmatmul.mubr.f32.vlgmr.msra.gmra.mrb[0].mxu0 %v4772_v62 }
 0x241   : > { %v1332_v20 = vpop.f32.mrb[0].mxu1  ;;  %v2187_v18 = vpop.f32.mrb[0].mxu0 }
 0x242   : > { %v2721_v16 = vadd.f32 %v2187_v18, %v1332_v20  ;;  %v1334_v29 = vpop.f32.mrb[1].mxu1  ;;  %v2189_v0 = vpop.f32.mrb[1].mxu0 }
 0x243   : > { %v2722_v21 = vadd.f32 %v2189_v0, %v1334_v29 }
 0x244   : > { %2192 = vst [vmem:[%s282_s19] sm:$0xff] %v2721_v16 }
 0x245   : > { %2193 = vst [vmem:[%s282_s19 + $0x8] sm:$0xff] %v2722_v21 }
 0x246 PF: > { %s18_s18 = sadd.s32 1, %s2876_s18  }
 0x247   : > { %p15_p3 = scmp.ge.s32.totalorder %s18_s18, 4  }
 0x249   :  { %17 = sbr.rel (!%p15_p3) target bundleno = 3 (0x3), region = 87 }
 0x250   :  { %2215 = vsyncpa [#allocation3], 1 }
 0x251   :  { %2217 = vsyncpa [#allocation3 + $0x1], 1 }
 0x252   :  { %2218 = vsyncpa [#allocation7], 1 }
 0x253   :  { %2219 = vsyncpa [#allocation4], 1 }
 0x254   :  { %2221 = vsyncpa [#allocation4 + $0x1], 1 }

</bundles_post_ra>
